<compile_context>
chip_gen: v5e
topology: v5e:2x2
jax: 0.10.0
libtpu: 0.0.40
codegen_flags: <defaults>
</compile_context>

<pallas_src>
import functools

import jax
import jax.numpy as jnp
from jax import lax
from jax.experimental import pallas as pl
from jax.experimental.pallas import tpu as pltpu

_PAD = 8  # guard rows around every conv-layer input for the shifted-window reads


# ------------------------------ kernel helpers ------------------------------ #

def _leaky(x):
    # LeakyReLU(0.2) as a single vmax.
    return jnp.maximum(x, 0.2 * x)


def _boundary_masks(rows, width, seq_len):
    """Masks marking the first / last row of every sample; O(1) in batch.

    Uses an exact float multiply + truncate-to-int to recover the sample index
    (the VPU has no integer divide), replacing the old O(batch) compare/OR loop.
    """
    row_id = lax.broadcasted_iota(jnp.int32, (rows, width), 0)
    q = ((row_id.astype(jnp.float32) + 0.5) * (1.0 / seq_len)).astype(jnp.int32)
    local = row_id - q * seq_len
    return local == 0, local == seq_len - 1


def _tap_matmul(x, pp_ref, w_off, cout):
    """x (rows, k) @ packed_params[w_off:w_off+k, :cout].

    k == 1 (distribution branch, layer 1) stays on the VPU as a broadcast FMA;
    wider taps go to the MXU.  No im2col concatenation in either case.
    """
    k = x.shape[1]
    if k == 1:
        return x * pp_ref[w_off:w_off + 1, 0:cout]
    # TODO(synk): taps with 1 < k <= 8 (component branch layer 1) could also be
    # per-channel VPU FMAs; kept as tiny per-tap MXU dots to avoid lane-offset
    # value slicing.
    return jnp.dot(x, pp_ref[w_off:w_off + k, 0:cout],
                   preferred_element_type=jnp.float32)


def _conv_block(in_ref, pp_ref, layout, w_name, b_name, rows, seq_len, y_ref):
    """Conv1d(k=3, s=1, p=1) + bias + LeakyReLU(0.2) + MaxPool1d(2).

    in_ref : padded input ref; valid rows (batch-major, channels-last) live at
             [_PAD, _PAD + rows).  Guard rows are either real zeros (layer 1,
             padded in the wrapper) or masked out below.
    y_ref  : (rows, cout) scratch used for the even/odd pooling selection.
    Returns the pooled (rows // 2, cout) value.
    """
    cin = in_ref.shape[1]
    w_off, w_rows, cout = layout[w_name]
    assert w_rows == 3 * cin
    b_off = layout[b_name][0]

    # Shifted "same"-padding windows straight out of the padded ref:
    # no zero-row concatenates, no extra full-tensor copies.
    x_m1 = in_ref[_PAD - 1:_PAD - 1 + rows, :]
    x_c = in_ref[_PAD:_PAD + rows, :]
    x_p1 = in_ref[_PAD + 1:_PAD + 1 + rows, :]

    first, last = _boundary_masks(rows, cin, seq_len)
    x_m1 = jnp.where(first, 0.0, x_m1)
    x_p1 = jnp.where(last, 0.0, x_p1)

    # One accumulating matmul per tap (tap-major weight rows), no lane concat.
    y = (_tap_matmul(x_m1, pp_ref, w_off, cout)
         + _tap_matmul(x_c, pp_ref, w_off + cin, cout)
         + _tap_matmul(x_p1, pp_ref, w_off + 2 * cin, cout))
    y = _leaky(y + pp_ref[b_off:b_off + 1, 0:cout])

    # MaxPool1d(2): rows are batch-major with an even seq_len at every stage, so
    # consecutive row pairs never straddle a sample.
    y_ref[...] = y
    half = rows // 2
    return jnp.maximum(y_ref[pl.ds(0, half, stride=2), :],
                       y_ref[pl.ds(1, half, stride=2), :])


def _conv_head(h_ref, pp_ref, layout, fw_name, fb_name, batch, lf):
    """Flatten + Linear(lf*C -> 1) without tiling the weight over the batch:
    stride-lf reads of the pooled activation are FMA'd against the (lf, C)
    head-weight rows, then a single lane reduction."""
    fw_off, _, c = layout[fw_name]
    fb_off = layout[fb_name][0]
    acc = h_ref[pl.ds(0, batch, stride=lf), :] * pp_ref[fw_off:fw_off + 1, 0:c]
    for l in range(1, lf):
        acc = acc + (h_ref[pl.ds(l, batch, stride=lf), :]
                     * pp_ref[fw_off + l:fw_off + l + 1, 0:c])
    return jnp.sum(acc, axis=1, keepdims=True) + pp_ref[fb_off:fb_off + 1, 0:1]


def _dense(x, pp_ref, layout, w_name, b_name, relu):
    w_off, k, fout = layout[w_name]
    b_off = layout[b_name][0]
    assert x.shape[1] == k
    y = _tap_matmul(x, pp_ref, w_off, fout) + pp_ref[b_off:b_off + 1, 0:fout]
    return _leaky(y) if relu else y


# --------------------------------- the kernel -------------------------------- #

def _disc_kernel(n_classes, layout,
                 dist_ref, prop_ref, comp_ref, pp_ref,
                 out_ref,
                 y1, a1, y2, a2, y3, h3):
    batch = prop_ref.shape[0]
    lf = n_classes // 8
    rows0 = batch * n_classes

    def conv_branch(x_ref, tag):
        p1 = _conv_block(x_ref, pp_ref, layout, tag + "w0", tag + "b0",
                         rows0, n_classes, y1)
        a1[_PAD:_PAD + rows0 // 2, :] = p1
        p2 = _conv_block(a1, pp_ref, layout, tag + "w1", tag + "b1",
                         rows0 // 2, n_classes // 2, y2)
        a2[_PAD:_PAD + rows0 // 4, :] = p2
        p3 = _conv_block(a2, pp_ref, layout, tag + "w2", tag + "b2",
                         rows0 // 4, n_classes // 4, y3)
        h3[...] = p3
        return _conv_head(h3, pp_ref, layout, tag + "fw", tag + "fb", batch, lf)

    # distribution branch
    s_d = conv_branch(dist_ref, "d")
    # component branch (reuses the same scratch buffers sequentially)
    s_c = conv_branch(comp_ref, "c")

    # proportion MLP: 3 x (Linear + LeakyReLU), final Fout=1 layer is a VPU
    # multiply + lane reduction (no N=1 MXU matmul).
    x = _dense(prop_ref[...], pp_ref, layout, "pw0", "pb0", relu=True)
    x = _dense(x, pp_ref, layout, "pw1", "pb1", relu=True)
    x = _dense(x, pp_ref, layout, "pw2", "pb2", relu=True)
    w_off, _, nf = layout["pw3"]
    b_off = layout["pb3"][0]
    s_p = (jnp.sum(x * pp_ref[w_off:w_off + 1, 0:nf], axis=1, keepdims=True)
           + pp_ref[b_off:b_off + 1, 0:1])

    out_ref[...] = (s_d + s_p + s_c) * (1.0 / 3.0)


# --------------------------------- wrapper ----------------------------------- #

def _pack_params(params):
    """Concatenate all 24 parameter tensors into one lane-dense f32 array
    (8-row-aligned blocks, lanes padded to a multiple of 128) so the kernel has
    4 operands instead of 27.  Returns (packed, {name: (row_off, rows, cols)})."""
    entries = []
    for i, (w, b) in enumerate(params["d_conv"]):
        entries += [("dw%d" % i, w), ("db%d" % i, b)]
    entries += [("dfw", params["d_fc"][0]), ("dfb", params["d_fc"][1])]
    for i, (w, b) in enumerate(params["p_fc"]):
        entries += [("pw%d" % i, w), ("pb%d" % i, b)]
    for i, (w, b) in enumerate(params["c_conv"]):
        entries += [("cw%d" % i, w), ("cb%d" % i, b)]
    entries += [("cfw", params["c_fc"][0]), ("cfb", params["c_fc"][1])]

    width = max(int(a.shape[1]) for _, a in entries)
    width = -(-width // 128) * 128
    layout, blocks, off = {}, [], 0
    for name, a in entries:
        a = jnp.asarray(a, jnp.float32)
        r, c = a.shape
        rp = -(-r // 8) * 8
        layout[name] = (off, r, c)
        blocks.append(jnp.zeros((rp, width), jnp.float32).at[:r, :c].set(a))
        off += rp
    return jnp.concatenate(blocks, axis=0), layout


@functools.partial(jax.jit,
                   static_argnames=("n_components", "n_classes", "n_features"))
def conv_discriminator_forward(params, distributions, proportions, components,
                               *, n_components, n_classes, n_features):
    assert n_classes % 8 == 0, "three MaxPool1d(2) stages require n_classes % 8 == 0"
    nf = n_features
    batch = proportions.shape[0]
    rows0 = batch * n_classes

    # Layout plumbing only: channels-last, batch folded into the row dimension,
    # +/- _PAD zero guard rows so the kernel reads the shifted conv windows as
    # plain ref slices (no in-kernel concatenates).
    dist2d = distributions.reshape(rows0, 1).astype(jnp.float32)
    comp2d = jnp.transpose(components, (0, 2, 1)).reshape(
        rows0, n_components).astype(jnp.float32)
    dist_pad = jnp.pad(dist2d, ((_PAD, _PAD), (0, 0)))
    comp_pad = jnp.pad(comp2d, ((_PAD, _PAD), (0, 0)))
    prop2d = proportions.reshape(batch, n_components).astype(jnp.float32)

    packed, layout = _pack_params(params)

    scratch_dims = [
        (rows0, nf),                           # y1: pre-pool activation, layer 1
        (rows0 // 2 + 2 * _PAD, nf),           # a1: padded input of layer 2
        (rows0 // 2, 2 * nf),                  # y2
        (rows0 // 4 + 2 * _PAD, 2 * nf),       # a2: padded input of layer 3
        (rows0 // 4, 4 * nf),                  # y3
        (rows0 // 8, 4 * nf),                  # h3: pooled layer-3 output (head input)
    ]
    scratch_shapes = [pltpu.VMEM(d, jnp.float32) for d in scratch_dims]

    def _nbytes(shape):
        n = 1
        for s in shape:
            n *= int(s)
        return 4 * n

    footprint = (sum(int(x.size) * 4 for x in (dist_pad, prop2d, comp_pad, packed))
                 + sum(_nbytes(d) for d in scratch_dims) + _nbytes((batch, 1)))
    vmem_limit = int(min(max(4 * footprint, 16 * 1024 * 1024), 64 * 1024 * 1024))

    kernel = functools.partial(_disc_kernel, n_classes, layout)
    return pl.pallas_call(
        kernel,
        out_shape=jax.ShapeDtypeStruct((batch, 1), jnp.float32),
        scratch_shapes=scratch_shapes,
        compiler_params=pltpu.CompilerParams(vmem_limit_bytes=vmem_limit),
    )(dist_pad, prop2d, comp_pad, packed)


# --------------------------- parameter initialization ------------------------ #

def _kaiming_conv(key, cin, cout):
    # kaiming_normal_ on Conv1d weight: fan_in = cin*3, gain sqrt(2); stored im2col
    # with tap-major rows [x[l-1] | x[l] | x[l+1]].
    std = (2.0 / (cin * 3)) ** 0.5
    return jax.random.normal(key, (3 * cin, cout), jnp.float32) * std


def _kaiming_linear(key, fin, fout):
    std = (2.0 / fin) ** 0.5
    return jax.random.normal(key, (fin, fout), jnp.float32) * std


def _kaiming_head(key, lf, c):
    std = (2.0 / (lf * c)) ** 0.5
    return jax.random.normal(key, (lf, c), jnp.float32) * std


def _uniform_bias(key, shape, fan_in):
    bound = 1.0 / (fan_in ** 0.5)
    return jax.random.uniform(key, shape, jnp.float32, -bound, bound)


def init_params(key, n_components, n_classes, n_features):
    assert n_classes % 8 == 0
    nf = n_features
    lf = n_classes // 8
    keys = iter(jax.random.split(key, 24))
    params = {"d_conv": [], "p_fc": [], "c_conv": []}

    for cin, cout in [(1, nf), (nf, 2 * nf), (2 * nf, 4 * nf)]:
        params["d_conv"].append((_kaiming_conv(next(keys), cin, cout),
                                 _uniform_bias(next(keys), (1, cout), cin * 3)))
    params["d_fc"] = (_kaiming_head(next(keys), lf, 4 * nf),
                      _uniform_bias(next(keys), (1, 1), lf * 4 * nf))

    for fin, fout in [(n_components, 4 * nf), (4 * nf, 2 * nf), (2 * nf, nf)]:
        params["p_fc"].append((_kaiming_linear(next(keys), fin, fout),
                               _uniform_bias(next(keys), (1, fout), fin)))
    params["p_fc"].append((_kaiming_linear(next(keys), nf, 1).reshape(1, nf),
                           _uniform_bias(next(keys), (1, 1), nf)))

    for cin, cout in [(n_components, nf), (nf, 2 * nf), (2 * nf, 4 * nf)]:
        params["c_conv"].append((_kaiming_conv(next(keys), cin, cout),
                                 _uniform_bias(next(keys), (1, cout), cin * 3)))
    params["c_fc"] = (_kaiming_head(next(keys), lf, 4 * nf),
                      _uniform_bias(next(keys), (1, 1), lf * 4 * nf))
    return params


# ------------------------------ pure-JAX reference --------------------------- #

def _ref_forward(params, distributions, proportions, components,
                 n_components, n_classes, n_features):
    hi = jax.lax.Precision.HIGHEST

    def leaky(v):
        return jnp.maximum(v, 0.2 * v)

    def conv_branch(x, conv_params, head):
        # x: (B, Cin, L) NCL, matching the PyTorch module
        for w, b in conv_params:
            cin = x.shape[1]
            cout = w.shape[1]
            w_oik = jnp.transpose(w.reshape(3, cin, cout), (2, 1, 0))  # (Cout, Cin, 3)
            y = lax.conv_general_dilated(
                x, w_oik, window_strides=(1,), padding=((1, 1),),
                dimension_numbers=("NCH", "OIH", "NCH"), precision=hi)
            y = leaky(y + b.reshape(1, cout, 1))
            bsz, c, l = y.shape
            x = jnp.max(y.reshape(bsz, c, l // 2, 2), axis=-1)   # MaxPool1d(2)
        hw, hb = head
        s = jnp.einsum("bcl,lc->b", x, hw, precision=hi)
        return s[:, None] + hb

    s_d = conv_branch(distributions.reshape(-1, 1, n_classes),
                      params["d_conv"], params["d_fc"])
    s_c = conv_branch(components, params["c_conv"], params["c_fc"])

    x = proportions.reshape(proportions.shape[0], -1)
    (pw1, pb1), (pw2, pb2), (pw3, pb3), (pw4, pb4) = params["p_fc"]
    for w, b in ((pw1, pb1), (pw2, pb2), (pw3, pb3)):
        x = leaky(jnp.dot(x, w, precision=hi) + b)
    s_p = jnp.dot(x, pw4.T, precision=hi) + pb4

    return (s_d + s_p + s_c) / 3.0


# ----------------------------------- main ------------------------------------ #

if __name__ == "__main__":
    B, n_components, n_classes, n_features = 2, 4, 16, 32

    key = jax.random.PRNGKey(0)
    k_params, k_dist, k_prop, k_comp = jax.random.split(key, 4)

    params = init_params(k_params, n_components, n_classes, n_features)
    distributions = jax.random.normal(k_dist, (B, n_classes), jnp.float32)
    proportions = jax.random.normal(k_prop, (B, n_components), jnp.float32)
    components = jax.random.normal(k_comp, (B, n_components, n_classes),
                                   jnp.float32)

    score = conv_discriminator_forward(
        params, distributions, proportions, components,
        n_components=n_components, n_classes=n_classes, n_features=n_features)
    score = jax.block_until_ready(score)
    assert score.shape == (B, 1), score.shape

    ref = _ref_forward(params, distributions, proportions, components,
                       n_components, n_classes, n_features)
    assert jnp.allclose(score, ref, rtol=2e-2, atol=2e-2), (score, ref)

    print("KERNEL_OK")
</pallas_src>

<mosaic_0001>
module attributes {stable_mosaic.version = 11 : i64} {
  func.func @_disc_kernel(%arg0: memref<48x1xf32, #tpu.memory_space<vmem>>, %arg1: memref<2x4xf32, #tpu.memory_space<vmem>>, %arg2: memref<48x4xf32, #tpu.memory_space<vmem>>, %arg3: memref<920x128xf32, #tpu.memory_space<vmem>>, %arg4: memref<2x1xf32, #tpu.memory_space<vmem>>, %arg5: memref<32x32xf32, #tpu.memory_space<vmem>>, %arg6: memref<32x32xf32, #tpu.memory_space<vmem>>, %arg7: memref<16x64xf32, #tpu.memory_space<vmem>>, %arg8: memref<24x64xf32, #tpu.memory_space<vmem>>, %arg9: memref<8x128xf32, #tpu.memory_space<vmem>>, %arg10: memref<4x128xf32, #tpu.memory_space<vmem>>) attributes {dimension_semantics = [], scalar_prefetch = 0 : i64, scratch_operands = 6 : i64, tpu.core_type = #tpu.core_type<tc>} {
    %c7 = arith.constant 7 : index
    %c0 = arith.constant 0 : index
    %0 = vector.load %arg0[%c7, %c0] : memref<48x1xf32, #tpu.memory_space<vmem>>, vector<32x1xf32>
    %c8 = arith.constant 8 : index
    %c0_0 = arith.constant 0 : index
    %1 = vector.load %arg0[%c8, %c0_0] : memref<48x1xf32, #tpu.memory_space<vmem>>, vector<32x1xf32>
    %c9 = arith.constant 9 : index
    %c0_1 = arith.constant 0 : index
    %2 = vector.load %arg0[%c9, %c0_1] : memref<48x1xf32, #tpu.memory_space<vmem>>, vector<32x1xf32>
    %3 = tpu.iota {dimensions = array<i32: 0>} : vector<32x1xi32>
    %4 = arith.sitofp %3 : vector<32x1xi32> to vector<32x1xf32>
    %cst = arith.constant 5.000000e-01 : f32
    %5 = vector.broadcast %cst : f32 to vector<32x1xf32>
    %6 = arith.addf %4, %5 : vector<32x1xf32>
    %cst_2 = arith.constant 6.250000e-02 : f32
    %7 = vector.broadcast %cst_2 : f32 to vector<32x1xf32>
    %8 = arith.mulf %6, %7 : vector<32x1xf32>
    %9 = arith.fptosi %8 : vector<32x1xf32> to vector<32x1xi32>
    %c16_i32 = arith.constant 16 : i32
    %10 = vector.broadcast %c16_i32 : i32 to vector<32x1xi32>
    %11 = arith.muli %9, %10 : vector<32x1xi32>
    %12 = arith.subi %3, %11 : vector<32x1xi32>
    %c0_i32 = arith.constant 0 : i32
    %13 = vector.broadcast %c0_i32 : i32 to vector<32x1xi32>
    %14 = arith.cmpi eq, %12, %13 : vector<32x1xi32>
    %c15_i32 = arith.constant 15 : i32
    %15 = vector.broadcast %c15_i32 : i32 to vector<32x1xi32>
    %16 = arith.cmpi eq, %12, %15 : vector<32x1xi32>
    %cst_3 = arith.constant 0.000000e+00 : f32
    %17 = vector.broadcast %cst_3 : f32 to vector<32x1xf32>
    %18 = arith.select %14, %17, %0 : vector<32x1xi1>, vector<32x1xf32>
    %cst_4 = arith.constant 0.000000e+00 : f32
    %19 = vector.broadcast %cst_4 : f32 to vector<32x1xf32>
    %20 = arith.select %16, %19, %2 : vector<32x1xi1>, vector<32x1xf32>
    %c0_5 = arith.constant 0 : index
    %c0_6 = arith.constant 0 : index
    %21 = vector.load %arg3[%c0_5, %c0_6] : memref<920x128xf32, #tpu.memory_space<vmem>>, vector<1x32xf32>
    %22 = vector.broadcast %18 : vector<32x1xf32> to vector<32x32xf32>
    %23 = vector.broadcast %21 : vector<1x32xf32> to vector<32x32xf32>
    %24 = arith.mulf %22, %23 : vector<32x32xf32>
    %c1 = arith.constant 1 : index
    %c0_7 = arith.constant 0 : index
    %25 = vector.load %arg3[%c1, %c0_7] : memref<920x128xf32, #tpu.memory_space<vmem>>, vector<1x32xf32>
    %26 = vector.broadcast %1 : vector<32x1xf32> to vector<32x32xf32>
    %27 = vector.broadcast %25 : vector<1x32xf32> to vector<32x32xf32>
    %28 = arith.mulf %26, %27 : vector<32x32xf32>
    %29 = arith.addf %24, %28 : vector<32x32xf32>
    %c2 = arith.constant 2 : index
    %c0_8 = arith.constant 0 : index
    %30 = vector.load %arg3[%c2, %c0_8] : memref<920x128xf32, #tpu.memory_space<vmem>>, vector<1x32xf32>
    %31 = vector.broadcast %20 : vector<32x1xf32> to vector<32x32xf32>
    %32 = vector.broadcast %30 : vector<1x32xf32> to vector<32x32xf32>
    %33 = arith.mulf %31, %32 : vector<32x32xf32>
    %34 = arith.addf %29, %33 : vector<32x32xf32>
    %c8_9 = arith.constant 8 : index
    %c0_10 = arith.constant 0 : index
    %35 = vector.load %arg3[%c8_9, %c0_10] : memref<920x128xf32, #tpu.memory_space<vmem>>, vector<1x32xf32>
    %36 = vector.broadcast %35 : vector<1x32xf32> to vector<32x32xf32>
    %37 = arith.addf %34, %36 : vector<32x32xf32>
    %cst_11 = arith.constant 2.000000e-01 : f32
    %38 = vector.broadcast %cst_11 : f32 to vector<32x32xf32>
    %39 = arith.mulf %38, %37 : vector<32x32xf32>
    %40 = arith.maximumf %37, %39 : vector<32x32xf32>
    %c0_12 = arith.constant 0 : index
    %c0_13 = arith.constant 0 : index
    %41 = vector.load %arg5[%c0_12, %c0_13] : memref<32x32xf32, #tpu.memory_space<vmem>>, vector<32x32xf32>
    tpu.vector_store %arg5[%c0_12, %c0_13], %40 {strides = array<i32>} : memref<32x32xf32, #tpu.memory_space<vmem>>, vector<32x32xf32>,
    %c0_14 = arith.constant 0 : index
    %c0_15 = arith.constant 0 : index
    %42 = tpu.strided_load %arg5[%c0_14, %c0_15] {strides = array<i32: 2, 1>} : memref<32x32xf32, #tpu.memory_space<vmem>>, vector<16x32xf32>
    %c1_16 = arith.constant 1 : index
    %c0_17 = arith.constant 0 : index
    %43 = tpu.strided_load %arg5[%c1_16, %c0_17] {strides = array<i32: 2, 1>} : memref<32x32xf32, #tpu.memory_space<vmem>>, vector<16x32xf32>
    %44 = arith.maximumf %42, %43 : vector<16x32xf32>
    %c8_18 = arith.constant 8 : index
    %c0_19 = arith.constant 0 : index
    %45 = vector.load %arg6[%c8_18, %c0_19] : memref<32x32xf32, #tpu.memory_space<vmem>>, vector<16x32xf32>
    tpu.vector_store %arg6[%c8_18, %c0_19], %44 {strides = array<i32>} : memref<32x32xf32, #tpu.memory_space<vmem>>, vector<16x32xf32>,
    %c7_20 = arith.constant 7 : index
    %c0_21 = arith.constant 0 : index
    %46 = vector.load %arg6[%c7_20, %c0_21] : memref<32x32xf32, #tpu.memory_space<vmem>>, vector<16x32xf32>
    %c8_22 = arith.constant 8 : index
    %c0_23 = arith.constant 0 : index
    %47 = vector.load %arg6[%c8_22, %c0_23] : memref<32x32xf32, #tpu.memory_space<vmem>>, vector<16x32xf32>
    %c9_24 = arith.constant 9 : index
    %c0_25 = arith.constant 0 : index
    %48 = vector.load %arg6[%c9_24, %c0_25] : memref<32x32xf32, #tpu.memory_space<vmem>>, vector<16x32xf32>
    %49 = tpu.iota {dimensions = array<i32: 0>} : vector<16x32xi32>
    %50 = arith.sitofp %49 : vector<16x32xi32> to vector<16x32xf32>
    %cst_26 = arith.constant 5.000000e-01 : f32
    %51 = vector.broadcast %cst_26 : f32 to vector<16x32xf32>
    %52 = arith.addf %50, %51 : vector<16x32xf32>
    %cst_27 = arith.constant 1.250000e-01 : f32
    %53 = vector.broadcast %cst_27 : f32 to vector<16x32xf32>
    %54 = arith.mulf %52, %53 : vector<16x32xf32>
    %55 = arith.fptosi %54 : vector<16x32xf32> to vector<16x32xi32>
    %c8_i32 = arith.constant 8 : i32
    %56 = vector.broadcast %c8_i32 : i32 to vector<16x32xi32>
    %57 = arith.muli %55, %56 : vector<16x32xi32>
    %58 = arith.subi %49, %57 : vector<16x32xi32>
    %c0_i32_28 = arith.constant 0 : i32
    %59 = vector.broadcast %c0_i32_28 : i32 to vector<16x32xi32>
    %60 = arith.cmpi eq, %58, %59 : vector<16x32xi32>
    %c7_i32 = arith.constant 7 : i32
    %61 = vector.broadcast %c7_i32 : i32 to vector<16x32xi32>
    %62 = arith.cmpi eq, %58, %61 : vector<16x32xi32>
    %cst_29 = arith.constant 0.000000e+00 : f32
    %63 = vector.broadcast %cst_29 : f32 to vector<16x32xf32>
    %64 = arith.select %60, %63, %46 : vector<16x32xi1>, vector<16x32xf32>
    %cst_30 = arith.constant 0.000000e+00 : f32
    %65 = vector.broadcast %cst_30 : f32 to vector<16x32xf32>
    %66 = arith.select %62, %65, %48 : vector<16x32xi1>, vector<16x32xf32>
    %c16 = arith.constant 16 : index
    %c0_31 = arith.constant 0 : index
    %67 = vector.load %arg3[%c16, %c0_31] : memref<920x128xf32, #tpu.memory_space<vmem>>, vector<32x64xf32>
    %cst_32 = arith.constant dense<0.000000e+00> : vector<16x64xf32>
    %68 = tpu.matmul %64, %67, %cst_32 {dimension_numbers = #tpu.dot_dimension_numbers<[1], [0], [0], [1], [0, 0, 1, 1], [], []>} : vector<16x32xf32>, vector<32x64xf32>, vector<16x64xf32> -> vector<16x64xf32>
    %c48 = arith.constant 48 : index
    %c0_33 = arith.constant 0 : index
    %69 = vector.load %arg3[%c48, %c0_33] : memref<920x128xf32, #tpu.memory_space<vmem>>, vector<32x64xf32>
    %cst_34 = arith.constant dense<0.000000e+00> : vector<16x64xf32>
    %70 = tpu.matmul %47, %69, %cst_34 {dimension_numbers = #tpu.dot_dimension_numbers<[1], [0], [0], [1], [0, 0, 1, 1], [], []>} : vector<16x32xf32>, vector<32x64xf32>, vector<16x64xf32> -> vector<16x64xf32>
    %71 = arith.addf %68, %70 : vector<16x64xf32>
    %c80 = arith.constant 80 : index
    %c0_35 = arith.constant 0 : index
    %72 = vector.load %arg3[%c80, %c0_35] : memref<920x128xf32, #tpu.memory_space<vmem>>, vector<32x64xf32>
    %cst_36 = arith.constant dense<0.000000e+00> : vector<16x64xf32>
    %73 = tpu.matmul %66, %72, %cst_36 {dimension_numbers = #tpu.dot_dimension_numbers<[1], [0], [0], [1], [0, 0, 1, 1], [], []>} : vector<16x32xf32>, vector<32x64xf32>, vector<16x64xf32> -> vector<16x64xf32>
    %74 = arith.addf %71, %73 : vector<16x64xf32>
    %c112 = arith.constant 112 : index
    %c0_37 = arith.constant 0 : index
    %75 = vector.load %arg3[%c112, %c0_37] : memref<920x128xf32, #tpu.memory_space<vmem>>, vector<1x64xf32>
    %76 = vector.broadcast %75 : vector<1x64xf32> to vector<16x64xf32>
    %77 = arith.addf %74, %76 : vector<16x64xf32>
    %cst_38 = arith.constant 2.000000e-01 : f32
    %78 = vector.broadcast %cst_38 : f32 to vector<16x64xf32>
    %79 = arith.mulf %78, %77 : vector<16x64xf32>
    %80 = arith.maximumf %77, %79 : vector<16x64xf32>
    %c0_39 = arith.constant 0 : index
    %c0_40 = arith.constant 0 : index
    %81 = vector.load %arg7[%c0_39, %c0_40] : memref<16x64xf32, #tpu.memory_space<vmem>>, vector<16x64xf32>
    tpu.vector_store %arg7[%c0_39, %c0_40], %80 {strides = array<i32>} : memref<16x64xf32, #tpu.memory_space<vmem>>, vector<16x64xf32>,
    %c0_41 = arith.constant 0 : index
    %c0_42 = arith.constant 0 : index
    %82 = tpu.strided_load %arg7[%c0_41, %c0_42] {strides = array<i32: 2, 1>} : memref<16x64xf32, #tpu.memory_space<vmem>>, vector<8x64xf32>
    %c1_43 = arith.constant 1 : index
    %c0_44 = arith.constant 0 : index
    %83 = tpu.strided_load %arg7[%c1_43, %c0_44] {strides = array<i32: 2, 1>} : memref<16x64xf32, #tpu.memory_space<vmem>>, vector<8x64xf32>
    %84 = arith.maximumf %82, %83 : vector<8x64xf32>
    %c8_45 = arith.constant 8 : index
    %c0_46 = arith.constant 0 : index
    %85 = vector.load %arg8[%c8_45, %c0_46] : memref<24x64xf32, #tpu.memory_space<vmem>>, vector<8x64xf32>
    tpu.vector_store %arg8[%c8_45, %c0_46], %84 {strides = array<i32>} : memref<24x64xf32, #tpu.memory_space<vmem>>, vector<8x64xf32>,
    %c7_47 = arith.constant 7 : index
    %c0_48 = arith.constant 0 : index
    %86 = vector.load %arg8[%c7_47, %c0_48] : memref<24x64xf32, #tpu.memory_space<vmem>>, vector<8x64xf32>
    %c8_49 = arith.constant 8 : index
    %c0_50 = arith.constant 0 : index
    %87 = vector.load %arg8[%c8_49, %c0_50] : memref<24x64xf32, #tpu.memory_space<vmem>>, vector<8x64xf32>
    %c9_51 = arith.constant 9 : index
    %c0_52 = arith.constant 0 : index
    %88 = vector.load %arg8[%c9_51, %c0_52] : memref<24x64xf32, #tpu.memory_space<vmem>>, vector<8x64xf32>
    %89 = tpu.iota {dimensions = array<i32: 0>} : vector<8x64xi32>
    %90 = arith.sitofp %89 : vector<8x64xi32> to vector<8x64xf32>
    %cst_53 = arith.constant 5.000000e-01 : f32
    %91 = vector.broadcast %cst_53 : f32 to vector<8x64xf32>
    %92 = arith.addf %90, %91 : vector<8x64xf32>
    %cst_54 = arith.constant 2.500000e-01 : f32
    %93 = vector.broadcast %cst_54 : f32 to vector<8x64xf32>
    %94 = arith.mulf %92, %93 : vector<8x64xf32>
    %95 = arith.fptosi %94 : vector<8x64xf32> to vector<8x64xi32>
    %c4_i32 = arith.constant 4 : i32
    %96 = vector.broadcast %c4_i32 : i32 to vector<8x64xi32>
    %97 = arith.muli %95, %96 : vector<8x64xi32>
    %98 = arith.subi %89, %97 : vector<8x64xi32>
    %c0_i32_55 = arith.constant 0 : i32
    %99 = vector.broadcast %c0_i32_55 : i32 to vector<8x64xi32>
    %100 = arith.cmpi eq, %98, %99 : vector<8x64xi32>
    %c3_i32 = arith.constant 3 : i32
    %101 = vector.broadcast %c3_i32 : i32 to vector<8x64xi32>
    %102 = arith.cmpi eq, %98, %101 : vector<8x64xi32>
    %cst_56 = arith.constant 0.000000e+00 : f32
    %103 = vector.broadcast %cst_56 : f32 to vector<8x64xf32>
    %104 = arith.select %100, %103, %86 : vector<8x64xi1>, vector<8x64xf32>
    %cst_57 = arith.constant 0.000000e+00 : f32
    %105 = vector.broadcast %cst_57 : f32 to vector<8x64xf32>
    %106 = arith.select %102, %105, %88 : vector<8x64xi1>, vector<8x64xf32>
    %c120 = arith.constant 120 : index
    %c0_58 = arith.constant 0 : index
    %107 = vector.load %arg3[%c120, %c0_58] : memref<920x128xf32, #tpu.memory_space<vmem>>, vector<64x128xf32>
    %cst_59 = arith.constant dense<0.000000e+00> : vector<8x128xf32>
    %108 = tpu.matmul %104, %107, %cst_59 {dimension_numbers = #tpu.dot_dimension_numbers<[1], [0], [0], [1], [0, 0, 1, 1], [], []>} : vector<8x64xf32>, vector<64x128xf32>, vector<8x128xf32> -> vector<8x128xf32>
    %c184 = arith.constant 184 : index
    %c0_60 = arith.constant 0 : index
    %109 = vector.load %arg3[%c184, %c0_60] : memref<920x128xf32, #tpu.memory_space<vmem>>, vector<64x128xf32>
    %cst_61 = arith.constant dense<0.000000e+00> : vector<8x128xf32>
    %110 = tpu.matmul %87, %109, %cst_61 {dimension_numbers = #tpu.dot_dimension_numbers<[1], [0], [0], [1], [0, 0, 1, 1], [], []>} : vector<8x64xf32>, vector<64x128xf32>, vector<8x128xf32> -> vector<8x128xf32>
    %111 = arith.addf %108, %110 : vector<8x128xf32>
    %c248 = arith.constant 248 : index
    %c0_62 = arith.constant 0 : index
    %112 = vector.load %arg3[%c248, %c0_62] : memref<920x128xf32, #tpu.memory_space<vmem>>, vector<64x128xf32>
    %cst_63 = arith.constant dense<0.000000e+00> : vector<8x128xf32>
    %113 = tpu.matmul %106, %112, %cst_63 {dimension_numbers = #tpu.dot_dimension_numbers<[1], [0], [0], [1], [0, 0, 1, 1], [], []>} : vector<8x64xf32>, vector<64x128xf32>, vector<8x128xf32> -> vector<8x128xf32>
    %114 = arith.addf %111, %113 : vector<8x128xf32>
    %c312 = arith.constant 312 : index
    %c0_64 = arith.constant 0 : index
    %115 = vector.load %arg3[%c312, %c0_64] : memref<920x128xf32, #tpu.memory_space<vmem>>, vector<1x128xf32>
    %116 = vector.broadcast %115 : vector<1x128xf32> to vector<8x128xf32>
    %117 = arith.addf %114, %116 : vector<8x128xf32>
    %cst_65 = arith.constant 2.000000e-01 : f32
    %118 = vector.broadcast %cst_65 : f32 to vector<8x128xf32>
    %119 = arith.mulf %118, %117 : vector<8x128xf32>
    %120 = arith.maximumf %117, %119 : vector<8x128xf32>
    %c0_66 = arith.constant 0 : index
    %c0_67 = arith.constant 0 : index
    %121 = vector.load %arg9[%c0_66, %c0_67] : memref<8x128xf32, #tpu.memory_space<vmem>>, vector<8x128xf32>
    tpu.vector_store %arg9[%c0_66, %c0_67], %120 {strides = array<i32>} : memref<8x128xf32, #tpu.memory_space<vmem>>, vector<8x128xf32>,
    %c0_68 = arith.constant 0 : index
    %c0_69 = arith.constant 0 : index
    %122 = tpu.strided_load %arg9[%c0_68, %c0_69] {strides = array<i32: 2, 1>} : memref<8x128xf32, #tpu.memory_space<vmem>>, vector<4x128xf32>
    %c1_70 = arith.constant 1 : index
    %c0_71 = arith.constant 0 : index
    %123 = tpu.strided_load %arg9[%c1_70, %c0_71] {strides = array<i32: 2, 1>} : memref<8x128xf32, #tpu.memory_space<vmem>>, vector<4x128xf32>
    %124 = arith.maximumf %122, %123 : vector<4x128xf32>
    %c0_72 = arith.constant 0 : index
    %c0_73 = arith.constant 0 : index
    %125 = vector.load %arg10[%c0_72, %c0_73] : memref<4x128xf32, #tpu.memory_space<vmem>>, vector<4x128xf32>
    tpu.vector_store %arg10[%c0_72, %c0_73], %124 {strides = array<i32>} : memref<4x128xf32, #tpu.memory_space<vmem>>, vector<4x128xf32>,
    %c0_74 = arith.constant 0 : index
    %c0_75 = arith.constant 0 : index
    %126 = tpu.strided_load %arg10[%c0_74, %c0_75] {strides = array<i32: 2, 1>} : memref<4x128xf32, #tpu.memory_space<vmem>>, vector<2x128xf32>
    %c320 = arith.constant 320 : index
    %c0_76 = arith.constant 0 : index
    %127 = vector.load %arg3[%c320, %c0_76] : memref<920x128xf32, #tpu.memory_space<vmem>>, vector<1x128xf32>
    %128 = vector.broadcast %127 : vector<1x128xf32> to vector<2x128xf32>
    %129 = arith.mulf %126, %128 : vector<2x128xf32>
    %c1_77 = arith.constant 1 : index
    %c0_78 = arith.constant 0 : index
    %130 = tpu.strided_load %arg10[%c1_77, %c0_78] {strides = array<i32: 2, 1>} : memref<4x128xf32, #tpu.memory_space<vmem>>, vector<2x128xf32>
    %c321 = arith.constant 321 : index
    %c0_79 = arith.constant 0 : index
    %131 = vector.load %arg3[%c321, %c0_79] : memref<920x128xf32, #tpu.memory_space<vmem>>, vector<1x128xf32>
    %132 = vector.broadcast %131 : vector<1x128xf32> to vector<2x128xf32>
    %133 = arith.mulf %130, %132 : vector<2x128xf32>
    %134 = arith.addf %129, %133 : vector<2x128xf32>
    %cst_80 = arith.constant dense<0.000000e+00> : vector<2xf32>
    %135 = vector.multi_reduction <add>, %134, %cst_80 [1] : vector<2x128xf32> to vector<2xf32>
    %136 = vector.shape_cast %135 : vector<2xf32> to vector<2x1xf32>
    %c328 = arith.constant 328 : index
    %c0_81 = arith.constant 0 : index
    %137 = vector.load %arg3[%c328, %c0_81] : memref<920x128xf32, #tpu.memory_space<vmem>>, vector<1x1xf32>
    %138 = vector.broadcast %137 : vector<1x1xf32> to vector<2x1xf32>
    %139 = arith.addf %136, %138 : vector<2x1xf32>
    %c7_82 = arith.constant 7 : index
    %c0_83 = arith.constant 0 : index
    %140 = vector.load %arg2[%c7_82, %c0_83] : memref<48x4xf32, #tpu.memory_space<vmem>>, vector<32x4xf32>
    %c8_84 = arith.constant 8 : index
    %c0_85 = arith.constant 0 : index
    %141 = vector.load %arg2[%c8_84, %c0_85] : memref<48x4xf32, #tpu.memory_space<vmem>>, vector<32x4xf32>
    %c9_86 = arith.constant 9 : index
    %c0_87 = arith.constant 0 : index
    %142 = vector.load %arg2[%c9_86, %c0_87] : memref<48x4xf32, #tpu.memory_space<vmem>>, vector<32x4xf32>
    %143 = tpu.iota {dimensions = array<i32: 0>} : vector<32x4xi32>
    %144 = arith.sitofp %143 : vector<32x4xi32> to vector<32x4xf32>
    %cst_88 = arith.constant 5.000000e-01 : f32
    %145 = vector.broadcast %cst_88 : f32 to vector<32x4xf32>
    %146 = arith.addf %144, %145 : vector<32x4xf32>
    %cst_89 = arith.constant 6.250000e-02 : f32
    %147 = vector.broadcast %cst_89 : f32 to vector<32x4xf32>
    %148 = arith.mulf %146, %147 : vector<32x4xf32>
    %149 = arith.fptosi %148 : vector<32x4xf32> to vector<32x4xi32>
    %c16_i32_90 = arith.constant 16 : i32
    %150 = vector.broadcast %c16_i32_90 : i32 to vector<32x4xi32>
    %151 = arith.muli %149, %150 : vector<32x4xi32>
    %152 = arith.subi %143, %151 : vector<32x4xi32>
    %c0_i32_91 = arith.constant 0 : i32
    %153 = vector.broadcast %c0_i32_91 : i32 to vector<32x4xi32>
    %154 = arith.cmpi eq, %152, %153 : vector<32x4xi32>
    %c15_i32_92 = arith.constant 15 : i32
    %155 = vector.broadcast %c15_i32_92 : i32 to vector<32x4xi32>
    %156 = arith.cmpi eq, %152, %155 : vector<32x4xi32>
    %cst_93 = arith.constant 0.000000e+00 : f32
    %157 = vector.broadcast %cst_93 : f32 to vector<32x4xf32>
    %158 = arith.select %154, %157, %140 : vector<32x4xi1>, vector<32x4xf32>
    %cst_94 = arith.constant 0.000000e+00 : f32
    %159 = vector.broadcast %cst_94 : f32 to vector<32x4xf32>
    %160 = arith.select %156, %159, %142 : vector<32x4xi1>, vector<32x4xf32>
    %c576 = arith.constant 576 : index
    %c0_95 = arith.constant 0 : index
    %161 = vector.load %arg3[%c576, %c0_95] : memref<920x128xf32, #tpu.memory_space<vmem>>, vector<4x32xf32>
    %cst_96 = arith.constant dense<0.000000e+00> : vector<32x32xf32>
    %162 = tpu.matmul %158, %161, %cst_96 {dimension_numbers = #tpu.dot_dimension_numbers<[1], [0], [0], [1], [0, 0, 1, 1], [], []>} : vector<32x4xf32>, vector<4x32xf32>, vector<32x32xf32> -> vector<32x32xf32>
    %c580 = arith.constant 580 : index
    %c0_97 = arith.constant 0 : index
    %163 = vector.load %arg3[%c580, %c0_97] : memref<920x128xf32, #tpu.memory_space<vmem>>, vector<4x32xf32>
    %cst_98 = arith.constant dense<0.000000e+00> : vector<32x32xf32>
    %164 = tpu.matmul %141, %163, %cst_98 {dimension_numbers = #tpu.dot_dimension_numbers<[1], [0], [0], [1], [0, 0, 1, 1], [], []>} : vector<32x4xf32>, vector<4x32xf32>, vector<32x32xf32> -> vector<32x32xf32>
    %165 = arith.addf %162, %164 : vector<32x32xf32>
    %c584 = arith.constant 584 : index
    %c0_99 = arith.constant 0 : index
    %166 = vector.load %arg3[%c584, %c0_99] : memref<920x128xf32, #tpu.memory_space<vmem>>, vector<4x32xf32>
    %cst_100 = arith.constant dense<0.000000e+00> : vector<32x32xf32>
    %167 = tpu.matmul %160, %166, %cst_100 {dimension_numbers = #tpu.dot_dimension_numbers<[1], [0], [0], [1], [0, 0, 1, 1], [], []>} : vector<32x4xf32>, vector<4x32xf32>, vector<32x32xf32> -> vector<32x32xf32>
    %168 = arith.addf %165, %167 : vector<32x32xf32>
    %c592 = arith.constant 592 : index
    %c0_101 = arith.constant 0 : index
    %169 = vector.load %arg3[%c592, %c0_101] : memref<920x128xf32, #tpu.memory_space<vmem>>, vector<1x32xf32>
    %170 = vector.broadcast %169 : vector<1x32xf32> to vector<32x32xf32>
    %171 = arith.addf %168, %170 : vector<32x32xf32>
    %cst_102 = arith.constant 2.000000e-01 : f32
    %172 = vector.broadcast %cst_102 : f32 to vector<32x32xf32>
    %173 = arith.mulf %172, %171 : vector<32x32xf32>
    %174 = arith.maximumf %171, %173 : vector<32x32xf32>
    %c0_103 = arith.constant 0 : index
    %c0_104 = arith.constant 0 : index
    %175 = vector.load %arg5[%c0_103, %c0_104] : memref<32x32xf32, #tpu.memory_space<vmem>>, vector<32x32xf32>
    tpu.vector_store %arg5[%c0_103, %c0_104], %174 {strides = array<i32>} : memref<32x32xf32, #tpu.memory_space<vmem>>, vector<32x32xf32>,
    %c0_105 = arith.constant 0 : index
    %c0_106 = arith.constant 0 : index
    %176 = tpu.strided_load %arg5[%c0_105, %c0_106] {strides = array<i32: 2, 1>} : memref<32x32xf32, #tpu.memory_space<vmem>>, vector<16x32xf32>
    %c1_107 = arith.constant 1 : index
    %c0_108 = arith.constant 0 : index
    %177 = tpu.strided_load %arg5[%c1_107, %c0_108] {strides = array<i32: 2, 1>} : memref<32x32xf32, #tpu.memory_space<vmem>>, vector<16x32xf32>
    %178 = arith.maximumf %176, %177 : vector<16x32xf32>
    %c8_109 = arith.constant 8 : index
    %c0_110 = arith.constant 0 : index
    %179 = vector.load %arg6[%c8_109, %c0_110] : memref<32x32xf32, #tpu.memory_space<vmem>>, vector<16x32xf32>
    tpu.vector_store %arg6[%c8_109, %c0_110], %178 {strides = array<i32>} : memref<32x32xf32, #tpu.memory_space<vmem>>, vector<16x32xf32>,
    %c7_111 = arith.constant 7 : index
    %c0_112 = arith.constant 0 : index
    %180 = vector.load %arg6[%c7_111, %c0_112] : memref<32x32xf32, #tpu.memory_space<vmem>>, vector<16x32xf32>
    %c8_113 = arith.constant 8 : index
    %c0_114 = arith.constant 0 : index
    %181 = vector.load %arg6[%c8_113, %c0_114] : memref<32x32xf32, #tpu.memory_space<vmem>>, vector<16x32xf32>
    %c9_115 = arith.constant 9 : index
    %c0_116 = arith.constant 0 : index
    %182 = vector.load %arg6[%c9_115, %c0_116] : memref<32x32xf32, #tpu.memory_space<vmem>>, vector<16x32xf32>
    %183 = tpu.iota {dimensions = array<i32: 0>} : vector<16x32xi32>
    %184 = arith.sitofp %183 : vector<16x32xi32> to vector<16x32xf32>
    %cst_117 = arith.constant 5.000000e-01 : f32
    %185 = vector.broadcast %cst_117 : f32 to vector<16x32xf32>
    %186 = arith.addf %184, %185 : vector<16x32xf32>
    %cst_118 = arith.constant 1.250000e-01 : f32
    %187 = vector.broadcast %cst_118 : f32 to vector<16x32xf32>
    %188 = arith.mulf %186, %187 : vector<16x32xf32>
    %189 = arith.fptosi %188 : vector<16x32xf32> to vector<16x32xi32>
    %c8_i32_119 = arith.constant 8 : i32
    %190 = vector.broadcast %c8_i32_119 : i32 to vector<16x32xi32>
    %191 = arith.muli %189, %190 : vector<16x32xi32>
    %192 = arith.subi %183, %191 : vector<16x32xi32>
    %c0_i32_120 = arith.constant 0 : i32
    %193 = vector.broadcast %c0_i32_120 : i32 to vector<16x32xi32>
    %194 = arith.cmpi eq, %192, %193 : vector<16x32xi32>
    %c7_i32_121 = arith.constant 7 : i32
    %195 = vector.broadcast %c7_i32_121 : i32 to vector<16x32xi32>
    %196 = arith.cmpi eq, %192, %195 : vector<16x32xi32>
    %cst_122 = arith.constant 0.000000e+00 : f32
    %197 = vector.broadcast %cst_122 : f32 to vector<16x32xf32>
    %198 = arith.select %194, %197, %180 : vector<16x32xi1>, vector<16x32xf32>
    %cst_123 = arith.constant 0.000000e+00 : f32
    %199 = vector.broadcast %cst_123 : f32 to vector<16x32xf32>
    %200 = arith.select %196, %199, %182 : vector<16x32xi1>, vector<16x32xf32>
    %c600 = arith.constant 600 : index
    %c0_124 = arith.constant 0 : index
    %201 = vector.load %arg3[%c600, %c0_124] : memref<920x128xf32, #tpu.memory_space<vmem>>, vector<32x64xf32>
    %cst_125 = arith.constant dense<0.000000e+00> : vector<16x64xf32>
    %202 = tpu.matmul %198, %201, %cst_125 {dimension_numbers = #tpu.dot_dimension_numbers<[1], [0], [0], [1], [0, 0, 1, 1], [], []>} : vector<16x32xf32>, vector<32x64xf32>, vector<16x64xf32> -> vector<16x64xf32>
    %c632 = arith.constant 632 : index
    %c0_126 = arith.constant 0 : index
    %203 = vector.load %arg3[%c632, %c0_126] : memref<920x128xf32, #tpu.memory_space<vmem>>, vector<32x64xf32>
    %cst_127 = arith.constant dense<0.000000e+00> : vector<16x64xf32>
    %204 = tpu.matmul %181, %203, %cst_127 {dimension_numbers = #tpu.dot_dimension_numbers<[1], [0], [0], [1], [0, 0, 1, 1], [], []>} : vector<16x32xf32>, vector<32x64xf32>, vector<16x64xf32> -> vector<16x64xf32>
    %205 = arith.addf %202, %204 : vector<16x64xf32>
    %c664 = arith.constant 664 : index
    %c0_128 = arith.constant 0 : index
    %206 = vector.load %arg3[%c664, %c0_128] : memref<920x128xf32, #tpu.memory_space<vmem>>, vector<32x64xf32>
    %cst_129 = arith.constant dense<0.000000e+00> : vector<16x64xf32>
    %207 = tpu.matmul %200, %206, %cst_129 {dimension_numbers = #tpu.dot_dimension_numbers<[1], [0], [0], [1], [0, 0, 1, 1], [], []>} : vector<16x32xf32>, vector<32x64xf32>, vector<16x64xf32> -> vector<16x64xf32>
    %208 = arith.addf %205, %207 : vector<16x64xf32>
    %c696 = arith.constant 696 : index
    %c0_130 = arith.constant 0 : index
    %209 = vector.load %arg3[%c696, %c0_130] : memref<920x128xf32, #tpu.memory_space<vmem>>, vector<1x64xf32>
    %210 = vector.broadcast %209 : vector<1x64xf32> to vector<16x64xf32>
    %211 = arith.addf %208, %210 : vector<16x64xf32>
    %cst_131 = arith.constant 2.000000e-01 : f32
    %212 = vector.broadcast %cst_131 : f32 to vector<16x64xf32>
    %213 = arith.mulf %212, %211 : vector<16x64xf32>
    %214 = arith.maximumf %211, %213 : vector<16x64xf32>
    %c0_132 = arith.constant 0 : index
    %c0_133 = arith.constant 0 : index
    %215 = vector.load %arg7[%c0_132, %c0_133] : memref<16x64xf32, #tpu.memory_space<vmem>>, vector<16x64xf32>
    tpu.vector_store %arg7[%c0_132, %c0_133], %214 {strides = array<i32>} : memref<16x64xf32, #tpu.memory_space<vmem>>, vector<16x64xf32>,
    %c0_134 = arith.constant 0 : index
    %c0_135 = arith.constant 0 : index
    %216 = tpu.strided_load %arg7[%c0_134, %c0_135] {strides = array<i32: 2, 1>} : memref<16x64xf32, #tpu.memory_space<vmem>>, vector<8x64xf32>
    %c1_136 = arith.constant 1 : index
    %c0_137 = arith.constant 0 : index
    %217 = tpu.strided_load %arg7[%c1_136, %c0_137] {strides = array<i32: 2, 1>} : memref<16x64xf32, #tpu.memory_space<vmem>>, vector<8x64xf32>
    %218 = arith.maximumf %216, %217 : vector<8x64xf32>
    %c8_138 = arith.constant 8 : index
    %c0_139 = arith.constant 0 : index
    %219 = vector.load %arg8[%c8_138, %c0_139] : memref<24x64xf32, #tpu.memory_space<vmem>>, vector<8x64xf32>
    tpu.vector_store %arg8[%c8_138, %c0_139], %218 {strides = array<i32>} : memref<24x64xf32, #tpu.memory_space<vmem>>, vector<8x64xf32>,
    %c7_140 = arith.constant 7 : index
    %c0_141 = arith.constant 0 : index
    %220 = vector.load %arg8[%c7_140, %c0_141] : memref<24x64xf32, #tpu.memory_space<vmem>>, vector<8x64xf32>
    %c8_142 = arith.constant 8 : index
    %c0_143 = arith.constant 0 : index
    %221 = vector.load %arg8[%c8_142, %c0_143] : memref<24x64xf32, #tpu.memory_space<vmem>>, vector<8x64xf32>
    %c9_144 = arith.constant 9 : index
    %c0_145 = arith.constant 0 : index
    %222 = vector.load %arg8[%c9_144, %c0_145] : memref<24x64xf32, #tpu.memory_space<vmem>>, vector<8x64xf32>
    %223 = tpu.iota {dimensions = array<i32: 0>} : vector<8x64xi32>
    %224 = arith.sitofp %223 : vector<8x64xi32> to vector<8x64xf32>
    %cst_146 = arith.constant 5.000000e-01 : f32
    %225 = vector.broadcast %cst_146 : f32 to vector<8x64xf32>
    %226 = arith.addf %224, %225 : vector<8x64xf32>
    %cst_147 = arith.constant 2.500000e-01 : f32
    %227 = vector.broadcast %cst_147 : f32 to vector<8x64xf32>
    %228 = arith.mulf %226, %227 : vector<8x64xf32>
    %229 = arith.fptosi %228 : vector<8x64xf32> to vector<8x64xi32>
    %c4_i32_148 = arith.constant 4 : i32
    %230 = vector.broadcast %c4_i32_148 : i32 to vector<8x64xi32>
    %231 = arith.muli %229, %230 : vector<8x64xi32>
    %232 = arith.subi %223, %231 : vector<8x64xi32>
    %c0_i32_149 = arith.constant 0 : i32
    %233 = vector.broadcast %c0_i32_149 : i32 to vector<8x64xi32>
    %234 = arith.cmpi eq, %232, %233 : vector<8x64xi32>
    %c3_i32_150 = arith.constant 3 : i32
    %235 = vector.broadcast %c3_i32_150 : i32 to vector<8x64xi32>
    %236 = arith.cmpi eq, %232, %235 : vector<8x64xi32>
    %cst_151 = arith.constant 0.000000e+00 : f32
    %237 = vector.broadcast %cst_151 : f32 to vector<8x64xf32>
    %238 = arith.select %234, %237, %220 : vector<8x64xi1>, vector<8x64xf32>
    %cst_152 = arith.constant 0.000000e+00 : f32
    %239 = vector.broadcast %cst_152 : f32 to vector<8x64xf32>
    %240 = arith.select %236, %239, %222 : vector<8x64xi1>, vector<8x64xf32>
    %c704 = arith.constant 704 : index
    %c0_153 = arith.constant 0 : index
    %241 = vector.load %arg3[%c704, %c0_153] : memref<920x128xf32, #tpu.memory_space<vmem>>, vector<64x128xf32>
    %cst_154 = arith.constant dense<0.000000e+00> : vector<8x128xf32>
    %242 = tpu.matmul %238, %241, %cst_154 {dimension_numbers = #tpu.dot_dimension_numbers<[1], [0], [0], [1], [0, 0, 1, 1], [], []>} : vector<8x64xf32>, vector<64x128xf32>, vector<8x128xf32> -> vector<8x128xf32>
    %c768 = arith.constant 768 : index
    %c0_155 = arith.constant 0 : index
    %243 = vector.load %arg3[%c768, %c0_155] : memref<920x128xf32, #tpu.memory_space<vmem>>, vector<64x128xf32>
    %cst_156 = arith.constant dense<0.000000e+00> : vector<8x128xf32>
    %244 = tpu.matmul %221, %243, %cst_156 {dimension_numbers = #tpu.dot_dimension_numbers<[1], [0], [0], [1], [0, 0, 1, 1], [], []>} : vector<8x64xf32>, vector<64x128xf32>, vector<8x128xf32> -> vector<8x128xf32>
    %245 = arith.addf %242, %244 : vector<8x128xf32>
    %c832 = arith.constant 832 : index
    %c0_157 = arith.constant 0 : index
    %246 = vector.load %arg3[%c832, %c0_157] : memref<920x128xf32, #tpu.memory_space<vmem>>, vector<64x128xf32>
    %cst_158 = arith.constant dense<0.000000e+00> : vector<8x128xf32>
    %247 = tpu.matmul %240, %246, %cst_158 {dimension_numbers = #tpu.dot_dimension_numbers<[1], [0], [0], [1], [0, 0, 1, 1], [], []>} : vector<8x64xf32>, vector<64x128xf32>, vector<8x128xf32> -> vector<8x128xf32>
    %248 = arith.addf %245, %247 : vector<8x128xf32>
    %c896 = arith.constant 896 : index
    %c0_159 = arith.constant 0 : index
    %249 = vector.load %arg3[%c896, %c0_159] : memref<920x128xf32, #tpu.memory_space<vmem>>, vector<1x128xf32>
    %250 = vector.broadcast %249 : vector<1x128xf32> to vector<8x128xf32>
    %251 = arith.addf %248, %250 : vector<8x128xf32>
    %cst_160 = arith.constant 2.000000e-01 : f32
    %252 = vector.broadcast %cst_160 : f32 to vector<8x128xf32>
    %253 = arith.mulf %252, %251 : vector<8x128xf32>
    %254 = arith.maximumf %251, %253 : vector<8x128xf32>
    %c0_161 = arith.constant 0 : index
    %c0_162 = arith.constant 0 : index
    %255 = vector.load %arg9[%c0_161, %c0_162] : memref<8x128xf32, #tpu.memory_space<vmem>>, vector<8x128xf32>
    tpu.vector_store %arg9[%c0_161, %c0_162], %254 {strides = array<i32>} : memref<8x128xf32, #tpu.memory_space<vmem>>, vector<8x128xf32>,
    %c0_163 = arith.constant 0 : index
    %c0_164 = arith.constant 0 : index
    %256 = tpu.strided_load %arg9[%c0_163, %c0_164] {strides = array<i32: 2, 1>} : memref<8x128xf32, #tpu.memory_space<vmem>>, vector<4x128xf32>
    %c1_165 = arith.constant 1 : index
    %c0_166 = arith.constant 0 : index
    %257 = tpu.strided_load %arg9[%c1_165, %c0_166] {strides = array<i32: 2, 1>} : memref<8x128xf32, #tpu.memory_space<vmem>>, vector<4x128xf32>
    %258 = arith.maximumf %256, %257 : vector<4x128xf32>
    %c0_167 = arith.constant 0 : index
    %c0_168 = arith.constant 0 : index
    %259 = vector.load %arg10[%c0_167, %c0_168] : memref<4x128xf32, #tpu.memory_space<vmem>>, vector<4x128xf32>
    tpu.vector_store %arg10[%c0_167, %c0_168], %258 {strides = array<i32>} : memref<4x128xf32, #tpu.memory_space<vmem>>, vector<4x128xf32>,
    %c0_169 = arith.constant 0 : index
    %c0_170 = arith.constant 0 : index
    %260 = tpu.strided_load %arg10[%c0_169, %c0_170] {strides = array<i32: 2, 1>} : memref<4x128xf32, #tpu.memory_space<vmem>>, vector<2x128xf32>
    %c904 = arith.constant 904 : index
    %c0_171 = arith.constant 0 : index
    %261 = vector.load %arg3[%c904, %c0_171] : memref<920x128xf32, #tpu.memory_space<vmem>>, vector<1x128xf32>
    %262 = vector.broadcast %261 : vector<1x128xf32> to vector<2x128xf32>
    %263 = arith.mulf %260, %262 : vector<2x128xf32>
    %c1_172 = arith.constant 1 : index
    %c0_173 = arith.constant 0 : index
    %264 = tpu.strided_load %arg10[%c1_172, %c0_173] {strides = array<i32: 2, 1>} : memref<4x128xf32, #tpu.memory_space<vmem>>, vector<2x128xf32>
    %c905 = arith.constant 905 : index
    %c0_174 = arith.constant 0 : index
    %265 = vector.load %arg3[%c905, %c0_174] : memref<920x128xf32, #tpu.memory_space<vmem>>, vector<1x128xf32>
    %266 = vector.broadcast %265 : vector<1x128xf32> to vector<2x128xf32>
    %267 = arith.mulf %264, %266 : vector<2x128xf32>
    %268 = arith.addf %263, %267 : vector<2x128xf32>
    %cst_175 = arith.constant dense<0.000000e+00> : vector<2xf32>
    %269 = vector.multi_reduction <add>, %268, %cst_175 [1] : vector<2x128xf32> to vector<2xf32>
    %270 = vector.shape_cast %269 : vector<2xf32> to vector<2x1xf32>
    %c912 = arith.constant 912 : index
    %c0_176 = arith.constant 0 : index
    %271 = vector.load %arg3[%c912, %c0_176] : memref<920x128xf32, #tpu.memory_space<vmem>>, vector<1x1xf32>
    %272 = vector.broadcast %271 : vector<1x1xf32> to vector<2x1xf32>
    %273 = arith.addf %270, %272 : vector<2x1xf32>
    %c0_177 = arith.constant 0 : index
    %c0_178 = arith.constant 0 : index
    %274 = vector.load %arg1[%c0_177, %c0_178] : memref<2x4xf32, #tpu.memory_space<vmem>>, vector<2x4xf32>
    %c336 = arith.constant 336 : index
    %c0_179 = arith.constant 0 : index
    %275 = vector.load %arg3[%c336, %c0_179] : memref<920x128xf32, #tpu.memory_space<vmem>>, vector<4x128xf32>
    %cst_180 = arith.constant dense<0.000000e+00> : vector<2x128xf32>
    %276 = tpu.matmul %274, %275, %cst_180 {dimension_numbers = #tpu.dot_dimension_numbers<[1], [0], [0], [1], [0, 0, 1, 1], [], []>} : vector<2x4xf32>, vector<4x128xf32>, vector<2x128xf32> -> vector<2x128xf32>
    %c344 = arith.constant 344 : index
    %c0_181 = arith.constant 0 : index
    %277 = vector.load %arg3[%c344, %c0_181] : memref<920x128xf32, #tpu.memory_space<vmem>>, vector<1x128xf32>
    %278 = vector.broadcast %277 : vector<1x128xf32> to vector<2x128xf32>
    %279 = arith.addf %276, %278 : vector<2x128xf32>
    %cst_182 = arith.constant 2.000000e-01 : f32
    %280 = vector.broadcast %cst_182 : f32 to vector<2x128xf32>
    %281 = arith.mulf %280, %279 : vector<2x128xf32>
    %282 = arith.maximumf %279, %281 : vector<2x128xf32>
    %c352 = arith.constant 352 : index
    %c0_183 = arith.constant 0 : index
    %283 = vector.load %arg3[%c352, %c0_183] : memref<920x128xf32, #tpu.memory_space<vmem>>, vector<128x64xf32>
    %cst_184 = arith.constant dense<0.000000e+00> : vector<2x64xf32>
    %284 = tpu.matmul %282, %283, %cst_184 {dimension_numbers = #tpu.dot_dimension_numbers<[1], [0], [0], [1], [0, 0, 1, 1], [], []>} : vector<2x128xf32>, vector<128x64xf32>, vector<2x64xf32> -> vector<2x64xf32>
    %c480 = arith.constant 480 : index
    %c0_185 = arith.constant 0 : index
    %285 = vector.load %arg3[%c480, %c0_185] : memref<920x128xf32, #tpu.memory_space<vmem>>, vector<1x64xf32>
    %286 = vector.broadcast %285 : vector<1x64xf32> to vector<2x64xf32>
    %287 = arith.addf %284, %286 : vector<2x64xf32>
    %cst_186 = arith.constant 2.000000e-01 : f32
    %288 = vector.broadcast %cst_186 : f32 to vector<2x64xf32>
    %289 = arith.mulf %288, %287 : vector<2x64xf32>
    %290 = arith.maximumf %287, %289 : vector<2x64xf32>
    %c488 = arith.constant 488 : index
    %c0_187 = arith.constant 0 : index
    %291 = vector.load %arg3[%c488, %c0_187] : memref<920x128xf32, #tpu.memory_space<vmem>>, vector<64x32xf32>
    %cst_188 = arith.constant dense<0.000000e+00> : vector<2x32xf32>
    %292 = tpu.matmul %290, %291, %cst_188 {dimension_numbers = #tpu.dot_dimension_numbers<[1], [0], [0], [1], [0, 0, 1, 1], [], []>} : vector<2x64xf32>, vector<64x32xf32>, vector<2x32xf32> -> vector<2x32xf32>
    %c552 = arith.constant 552 : index
    %c0_189 = arith.constant 0 : index
    %293 = vector.load %arg3[%c552, %c0_189] : memref<920x128xf32, #tpu.memory_space<vmem>>, vector<1x32xf32>
    %294 = vector.broadcast %293 : vector<1x32xf32> to vector<2x32xf32>
    %295 = arith.addf %292, %294 : vector<2x32xf32>
    %cst_190 = arith.constant 2.000000e-01 : f32
    %296 = vector.broadcast %cst_190 : f32 to vector<2x32xf32>
    %297 = arith.mulf %296, %295 : vector<2x32xf32>
    %298 = arith.maximumf %295, %297 : vector<2x32xf32>
    %c560 = arith.constant 560 : index
    %c0_191 = arith.constant 0 : index
    %299 = vector.load %arg3[%c560, %c0_191] : memref<920x128xf32, #tpu.memory_space<vmem>>, vector<1x32xf32>
    %300 = vector.broadcast %299 : vector<1x32xf32> to vector<2x32xf32>
    %301 = arith.mulf %298, %300 : vector<2x32xf32>
    %cst_192 = arith.constant dense<0.000000e+00> : vector<2xf32>
    %302 = vector.multi_reduction <add>, %301, %cst_192 [1] : vector<2x32xf32> to vector<2xf32>
    %303 = vector.shape_cast %302 : vector<2xf32> to vector<2x1xf32>
    %c568 = arith.constant 568 : index
    %c0_193 = arith.constant 0 : index
    %304 = vector.load %arg3[%c568, %c0_193] : memref<920x128xf32, #tpu.memory_space<vmem>>, vector<1x1xf32>
    %305 = vector.broadcast %304 : vector<1x1xf32> to vector<2x1xf32>
    %306 = arith.addf %303, %305 : vector<2x1xf32>
    %307 = arith.addf %139, %306 : vector<2x1xf32>
    %308 = arith.addf %307, %273 : vector<2x1xf32>
    %cst_194 = arith.constant 0.333333343 : f32
    %309 = vector.broadcast %cst_194 : f32 to vector<2x1xf32>
    %310 = arith.mulf %308, %309 : vector<2x1xf32>
    %c0_195 = arith.constant 0 : index
    %c0_196 = arith.constant 0 : index
    %311 = vector.load %arg4[%c0_195, %c0_196] : memref<2x1xf32, #tpu.memory_space<vmem>>, vector<2x1xf32>
    tpu.vector_store %arg4[%c0_195, %c0_196], %310 {strides = array<i32>} : memref<2x1xf32, #tpu.memory_space<vmem>>, vector<2x1xf32>,
    return
  }
}

</mosaic_0001>

<bundles_post_ra>
// kernel: conv_discriminator_forward.1
= control target key start
LH: loop header
LB: loop body
LE: loop exit
PB: predicated region body
PF: predicated region fallthrough
CT: control target
= control target key end

     0   :  { %v29_v0 = vlaneseq  ;;  %v1123_v1 = vmov 0   ;;  %vm174_vm12 = vcmask 261120   ;;  %s1780_s0 = inlined_call_operand.vmem [shape: f32[48,1], index: 0, kind: input, shape index: {}]   ;;  %s1781_s3 = inlined_call_operand.vmem [shape: f32[920,128], index: 3, kind: input, shape index: {}]   ;;  %s1782_s2 = inlined_call_operand.vmem [shape: f32[48,4], index: 2, kind: input, shape index: {}]   ;;  %s1783_s1 = inlined_call_operand.vmem [shape: f32[2,4], index: 1, kind: input, shape index: {}]   ;;  %s1784_s4 = inlined_call_operand.vmem [shape: f32[2,1], index: 4, kind: output, shape index: {}]  }
   0x1   :  { %1100 = vset.pattern.permute.xlu1 %v1123_v1  ;;  %v21_v2 = vld [vmem:[%s1780_s0 + $0x8] sm:$0xff]  ;;  %1102 = vset.pattern.permute.xlu0 %v1123_v1  ;;  %v23_v4 = vld [vmem:[%s1780_s0 + $0x18] sm:$0xff]  ;;  %v22_v9 = vld [vmem:[%s1780_s0 + $0x10] sm:$0xff] }
   0x2   :  { %103 = vperm.xlu1 %1100, %v21_v2   ;;  %v1152_v3 = vshrl.u32 %v29_v0, 7  ;;  %1101 = vset.pattern.permute.xlu2 %v1123_v1  ;;  %v17_v37 = vld [vmem:[%s1780_s0 + $0x7] sm:$0xff]  ;;  %v20_v43 = vld [vmem:[%s1780_s0 + $0x1f] sm:$0xff]  ;;  %v18_v51 = vld [vmem:[%s1780_s0 + $0xf] sm:$0xff] }
   0x3   :  { %113 = vperm.xlu2 %1101, %v23_v4   ;;  %v25_v40 = vld [vmem:[%s1780_s0 + $0x9] sm:$0xff]  ;;  %v26_v52 = vld [vmem:[%s1780_s0 + $0x11] sm:$0xff]  ;;  %v27_v53 = vld [vmem:[%s1780_s0 + $0x19] sm:$0xff] }
   0x4   :  { %v34_v5 = vcvt.s32.f32 %v1152_v3  ;;  %v33_v6 = vadd.s32 24, %v1152_v3  ;;  %v1160_v7 = vadd.s32 8, %v1152_v3  ;;  %v32_v8 = vadd.s32 16, %v1152_v3  ;;  %v19_v57 = vld [vmem:[%s1780_s0 + $0x17] sm:$0xff]  ;;  %v28_v58 = vld [vmem:[%s1780_s0 + $0x21] sm:$0xff] }
   0x5   :  { %v24_v61 = vld [vmem:[%s1780_s0 + $0x20] sm:$0xff] }
   0x6   :  { %v1166_v10 = vadd.f32 0.5, %v34_v5  ;;  %v37_v11 = vcvt.s32.f32 %v33_v6  ;;  %v35_v12 = vcvt.s32.f32 %v1160_v7  ;;  %v36_v13 = vcvt.s32.f32 %v32_v8  ;;  %v1237_v0 = vld [vmem:[%s1781_s3 + $0x1] ss:$0 sm:$0xff]  ;;  %v1242_v2 = vld [vmem:[%s1781_s3 + $0x2] ss:$0 sm:$0xff] }
   0x7   :  { %v1247_v4 = vld [vmem:[%s1781_s3] ss:$0 sm:$0xff] }
   0x8   :  { %v42_v14 = vmul.f32 0.0625, %v1166_v10  ;;  %v41_v15 = vadd.f32 0.5, %v37_v11  ;;  %v1170_v16 = vadd.f32 0.5, %v35_v12  ;;  %v40_v17 = vadd.f32 0.5, %v36_v13  ;;  %v215_v11 = vld [vmem:[%s1781_s3 + $0x28] sm:$0xff] }
   0x9   :  { %267 = vmatpush.msra.mxu1 %v215_v11 }
   0xa   :  { %108 = vperm.xlu1 %1100, %v22_v9   ;;  %vm1064_vm0 = vcmp.lt.s32.totalorder %v42_v14, 0  ;;  %v1065_v18 = vceil.f32 %v42_v14  ;;  %v1066_v19 = vfloor.f32 %v42_v14  ;;  %v45_v20 = vmul.f32 0.0625, %v41_v15  ;;  %v218_v14 = vld [vmem:[%s1781_s3 + $0x40] sm:$0xff] }
   0xb   :  { %v43_v21 = vmul.f32 0.0625, %v1170_v16  ;;  %v44_v22 = vmul.f32 0.0625, %v40_v17  ;;  %v214_v15 = vld [vmem:[%s1781_s3 + $0x20] sm:$0xff]  ;;  %v1267_v17 = vld [vmem:[%s1781_s3 + $0x8] ss:$0 sm:$0xff] }
   0xc   :  { %v1067_v23 = vsel %vm1064_vm0, %v1065_v18, %v1066_v19  ;;  %vm1079_vm1 = vcmp.lt.s32.totalorder %v45_v20, 0  ;;  %v1080_v24 = vceil.f32 %v45_v20  ;;  %v1081_v25 = vfloor.f32 %v45_v20  ;;  %268 = vmatpush.msra.mxu1 %v214_v15  ;;  %v217_v19 = vld [vmem:[%s1781_s3 + $0x38] sm:$0xff] }
   0xd   :  { %v1068_v26 = vcvt.f32.s32 %v1067_v23  ;;  %vm1069_vm2 = vcmp.lt.s32.totalorder %v43_v21, 0  ;;  %v1070_v27 = vceil.f32 %v43_v21  ;;  %v1071_v28 = vfloor.f32 %v43_v21  ;;  %v213_v20 = vld [vmem:[%s1781_s3 + $0x18] sm:$0xff] }
   0xe   :  { %v1082_v29 = vsel %vm1079_vm1, %v1080_v24, %v1081_v25  ;;  %vm1074_vm3 = vcmp.lt.s32.totalorder %v44_v22, 0  ;;  %v1075_v30 = vceil.f32 %v44_v22  ;;  %v1076_v31 = vfloor.f32 %v44_v22  ;;  %269 = vmatpush.msra.mxu1 %v213_v20  ;;  %v216_v22 = vld [vmem:[%s1781_s3 + $0x30] sm:$0xff] }
   0xf   :  { %v50_v32 = vmul.u32 16, %v1068_v26  ;;  %v1083_v33 = vcvt.f32.s32 %v1082_v29  ;;  %v1072_v34 = vsel %vm1069_vm2, %v1070_v27, %v1071_v28  ;;  %v212_v24 = vld [vmem:[%s1781_s3 + $0x10] sm:$0xff]  ;;  %v281_v27 = vld [vmem:[%s1781_s3 + $0x68] sm:$0xff]  ;;  %v280_v28 = vld [vmem:[%s1781_s3 + $0x60] sm:$0xff] }
  0x10   :  { %v1073_v35 = vcvt.f32.s32 %v1072_v34  ;;  %v1077_v36 = vsel %vm1074_vm3, %v1075_v30, %v1076_v31  ;;  %270 = vmatpush.msra.mxu1 %v212_v24  ;;  %vm1786_vm3 = vcmask 1043456  }
  0x11   :  { %v1177_v38 = vsub.s32 %v1152_v3, %v50_v32  ;;  %v53_v39 = vmul.u32 16, %v1083_v33  ;;  %v1078_v41 = vcvt.f32.s32 %v1077_v36 }
  0x12   :  { %v51_v42 = vmul.u32 16, %v1073_v35  ;;  %300 = vmatpush.msrb.mxu1 %v281_v27 }
  0x13   :  { %vm58_vm4 = vcmp.eq.s32.totalorder %v1177_v38, 0  ;;  %v1186_v44 = vsub.s32 %v33_v6, %v53_v39  ;;  %vm62_vm5 = vcmp.eq.s32.totalorder %v1177_v38, 15  ;;  %v52_v45 = vmul.u32 16, %v1078_v41  ;;  %v219_v6 = vld [vmem:[%s1781_s3 + $0x48] sm:$0xff]  ;;  %v464_v38 = vld [vmem:[%s1782_s2 + $0x17] sm:$0xff] }
  0x14   :  { %v66_v46 = vsel %vm58_vm4, 0.0, %v17_v37  ;;  %v1192_v47 = vsub.s32 %v1160_v7, %v51_v42  ;;  %v70_v48 = vsel %vm62_vm5, 0.0, %v25_v40  ;;  %238 = vmatpush.msra.mxu3 %v219_v6  ;;  %301 = vmatpush.msrb.mxu1 %v280_v28  ;;  %v196_v37 = vmul.f32 0.125, %v1166_v10 }
  0x15   :  { %77 = vperm.xlu0 %1102, %v66_v46   ;;  %vm61_vm6 = vcmp.eq.s32.totalorder %v1186_v44, 0  ;;  %133 = vperm.xlu2 %1101, %v70_v48   ;;  %v1197_v49 = vsub.s32 %v32_v8, %v52_v45  ;;  %vm65_vm11 = vcmp.eq.s32.totalorder %v1186_v44, 15  ;;  %v666_v44 = vld [vmem:[%s1781_s3 + $0x290] sm:$0xff] }
  0x16   :  { %v69_v50 = vsel %vm61_vm6, 0.0, %v20_v43  ;;  %vm59_vm7 = vcmp.eq.s32.totalorder %v1192_v47, 0  ;;  %vm63_vm8 = vcmp.eq.s32.totalorder %v1192_v47, 15  ;;  %v73_v60 = vsel %vm65_vm11, 0.0, %v28_v58  ;;  %239 = vmatpush.msra.mxu3 %v218_v14  ;;  %v465_v47 = vld [vmem:[%s1782_s2 + $0x1f] sm:$0xff] }
  0x17   :  { %92 = vperm.xlu1 %1100, %v69_v50   ;;  %vm64_vm9 = vcmp.eq.s32.totalorder %v1197_v49, 15  ;;  %v67_v54 = vsel %vm59_vm7, 0.0, %v18_v51  ;;  %v71_v55 = vsel %vm63_vm8, 0.0, %v26_v52  ;;  %vm60_vm10 = vcmp.eq.s32.totalorder %v1197_v49, 0 }
  0x18   :  { %v72_v56 = vsel %vm64_vm9, 0.0, %v27_v53  ;;  %v68_v59 = vsel %vm60_vm10, 0.0, %v19_v57  ;;  %240 = vmatpush.msra.mxu3 %v217_v19  ;;  %v1085_v46 = vceil.f32 %v196_v37  ;;  %v1086_v48 = vfloor.f32 %v196_v37 }
  0x19   :  { %vm1084_vm13 = vcmp.lt.s32.totalorder %v196_v37, 0  ;;  %v197_v14 = vmul.f32 0.125, %v1170_v16  ;;  %v409_v37 = vld [vmem:[%s1781_s3 + $0x130] sm:$0xff] }
  0x1a   :  { %241 = vmatpush.msra.mxu3 %v216_v22 }
  0x1b   :  { %v1090_v15 = vceil.f32 %v197_v14  ;;  %vm1089_vm14 = vcmp.lt.s32.totalorder %v197_v14, 0 }
  0x1d   :  { %82 = vperm.xlu0 %1102, %v67_v54   ;;  %138 = vperm.xlu2 %1101, %v71_v55   ;;  %v1087_v54 = vsel %vm1084_vm13, %v1085_v46, %v1086_v48  ;;  %v345_v46 = vld [vmem:[%s1781_s3 + $0xa0] sm:$0xff]  ;;  %vm484_vm13 = vcmask 31744  }
  0x1e   :  { %v1088_v58 = vcvt.f32.s32 %v1087_v54  ;;  %v407_v48 = vld [vmem:[%s1781_s3 + $0x120] sm:$0xff]  ;;  %v405_v54 = vld [vmem:[%s1781_s3 + $0x110] sm:$0xff] }
  0x1f   :  { %143 = vperm.xlu1 %1100, %v72_v56  }
  0x20   :  { %v200_v11 = vmul.u32 8, %v1088_v58  ;;  %v404_v58 = vld [vmem:[%s1781_s3 + $0x108] sm:$0xff] }
  0x25   :  { %87 = vperm.xlu0 %1102, %v68_v59   ;;  %148 = vperm.xlu2 %1101, %v73_v60   ;;  %v279_v59 = vld [vmem:[%s1781_s3 + $0x58] sm:$0xff]  ;;  %v278_v60 = vld [vmem:[%s1781_s3 + $0x50] sm:$0xff] }
  0x26   :  { %302 = vmatpush.msrb.mxu1 %v279_v59  ;;  %v349_v59 = vld [vmem:[%s1781_s3 + $0xc0] sm:$0xff] }
  0x28   :  { %303 = vmatpush.msrb.mxu1 %v278_v60 }
  0x2d   :  { %118 = vperm.xlu0 %1102, %v24_v61  }
  0x5d   :  { %v114_v63 = vpop.permute.xlu2 %113 }
  0x5e   :  { %v124_v40 = vmul.f32 %v1237_v0, %v114_v63 }
  0x6f   :  { %v134_v8 = vpop.permute.xlu2 %133 }
  0x70   :  { %v152_v12 = vmul.f32 %v1242_v2, %v134_v8 }
  0x74   :  { %v104_v62 = vpop.permute.xlu1 %103 }
  0x75   :  { %v122_v5 = vmul.f32 %v1237_v0, %v104_v62 }
  0x77   :  { %v139_v32 = vpop.permute.xlu2 %138 }
  0x78   :  { %v153_v33 = vmul.f32 %v1242_v2, %v139_v32 }
  0x7c   :  { %v109_v1 = vpop.permute.xlu1 %108 }
  0x7d   :  { %v123_v29 = vmul.f32 %v1237_v0, %v109_v1 }
  0x7f   :  { %v149_v56 = vpop.permute.xlu2 %148 }
  0x80   :  { %v155_v1 = vmul.f32 %v1242_v2, %v149_v56  ;;  %v350_v56 = vld [vmem:[%s1781_s3 + $0xc8] sm:$0xff] }
  0x87   :  { %v78_v9 = vpop.permute.xlu0 %77 }
  0x88   :  { %v96_v13 = vmul.f32 %v1247_v4, %v78_v9 }
  0x89   :  { %v93_v23 = vpop.permute.xlu1 %92 }
  0x8a   :  { %v126_v18 = vadd.f32 %v122_v5, %v96_v13  ;;  %v99_v61 = vmul.f32 %v1247_v4, %v93_v23 }
  0x8c   :  { %v156_v21 = vadd.f32 %v152_v12, %v126_v18  ;;  %v1091_v18 = vfloor.f32 %v197_v14  ;;  %v483_v14 = vld [vmem:[%s1781_s3 + $0x244] sm:$0xf] }
  0x8d   :  { %1033 = vmatpush.msk.msra.mxu2 %vm1786_vm3, %v483_v14  ;;  %v664_v14 = vld [vmem:[%s1781_s3 + $0x280] sm:$0xff] }
  0x8e   :  { %v162_v25 = vadd.f32 %v1267_v17, %v156_v21  ;;  %v1092_v20 = vsel %vm1089_vm14, %v1090_v15, %v1091_v18  ;;  %vm321_vm14 = vcmask 523264  }
  0x8f   :  { %v83_v26 = vpop.permute.xlu0 %82  ;;  %1060 = vmatpush.msrb.mxu2 %v666_v44 }
  0x90   :  { %v166_v30 = vmul.f32 0.2, %v162_v25  ;;  %v97_v31 = vmul.f32 %v1247_v4, %v83_v26 }
  0x91   :  { %v144_v41 = vpop.permute.xlu1 %143 }
  0x92   :  { %v170_v34 = vmax.f32 %v162_v25, %v166_v30  ;;  %v127_v35 = vadd.f32 %v123_v29, %v97_v31  ;;  %v154_v51 = vmul.f32 %v1242_v2, %v144_v41  ;;  %v408_v41 = vld [vmem:[%s1781_s3 + $0x128] sm:$0xff] }
  0x94   :  { %175 = vst.msk [vmem:[#allocation2] sm:$0xff] %vm174_vm12, %v170_v34  ;;  %v157_v36 = vadd.f32 %v153_v33, %v127_v35  ;;  %v355_v35 = vld [vmem:[%s1781_s3 + $0xf0] sm:$0xff] }
  0x95   :  { %367 = vmatpush.msrb.mxu3 %v355_v35 }
  0x96   :  { %v163_v39 = vadd.f32 %v1267_v17, %v157_v36  ;;  %v347_v36 = vld [vmem:[%s1781_s3 + $0xb0] sm:$0xff] }
  0x97   :  { %v88_v42 = vpop.permute.xlu0 %87  ;;  %390 = vmatpush.msra.mxu0 %v347_v36 }
  0x98   :  { %v167_v43 = vmul.f32 0.2, %v163_v39  ;;  %v98_v45 = vmul.f32 %v1247_v4, %v88_v42 }
  0x9a   :  { %v171_v50 = vmax.f32 %v163_v39, %v167_v43  ;;  %v128_v52 = vadd.f32 %v124_v40, %v98_v45  ;;  %v354_v39 = vld [vmem:[%s1781_s3 + $0xe8] sm:$0xff]  ;;  %v353_v43 = vld [vmem:[%s1781_s3 + $0xe0] sm:$0xff]  ;;  %v352_v45 = vld [vmem:[%s1781_s3 + $0xd8] sm:$0xff] }
  0x9b   :  { %368 = vmatpush.msrb.mxu3 %v354_v39  ;;  %v346_v40 = vld [vmem:[%s1781_s3 + $0xa8] sm:$0xff] }
  0x9c   :  { %176 = vst.msk [vmem:[#allocation2 + $0x8] sm:$0xff] %vm174_vm12, %v171_v50  ;;  %v158_v53 = vadd.f32 %v154_v51, %v128_v52  ;;  %391 = vmatpush.msra.mxu0 %v346_v40  ;;  %v344_v50 = vld [vmem:[%s1781_s3 + $0x98] sm:$0xff]  ;;  %v351_v51 = vld [vmem:[%s1781_s3 + $0xd0] sm:$0xff] }
  0x9d   :  { %369 = vmatpush.msrb.mxu3 %v353_v43  ;;  %v406_v52 = vld [vmem:[%s1781_s3 + $0x118] sm:$0xff] }
  0x9e   :  { %v164_v55 = vadd.f32 %v1267_v17, %v158_v53  ;;  %392 = vmatpush.msra.mxu0 %v345_v46  ;;  %v343_v53 = vld [vmem:[%s1781_s3 + $0x90] sm:$0xff] }
  0x9f   :  { %v119_v57 = vpop.permute.xlu0 %118  ;;  %370 = vmatpush.msrb.mxu3 %v352_v45  ;;  %v463_v45 = vld [vmem:[%s1782_s2 + $0xf] sm:$0xff] }
  0xa0   :  { %v168_v62 = vmul.f32 0.2, %v164_v55  ;;  %v125_v63 = vmul.f32 %v1237_v0, %v119_v57  ;;  %v1313_v0 = vsub.s32 %v1152_v3, %v200_v11  ;;  %393 = vmatpush.msra.mxu0 %v344_v50  ;;  %v342_v57 = vld [vmem:[%s1781_s3 + $0x88] sm:$0xff]  ;;  %v402_v11 = vld [vmem:[%s1781_s3 + $0xf8] sm:$0xff] }
  0xa1   :  { %371 = vmatpush.msrb.mxu3 %v351_v51  ;;  %v471_v46 = vld [vmem:[%s1782_s2 + $0x11] sm:$0xff]  ;;  %v472_v51 = vld [vmem:[%s1782_s2 + $0x19] sm:$0xff] }
  0xa2   :  { %v172_v5 = vmax.f32 %v164_v55, %v168_v62  ;;  %v129_v6 = vadd.f32 %v125_v63, %v99_v61  ;;  %vm204_vm15 = vcmp.eq.s32.totalorder %v1313_v0, 0  ;;  %vm206_vm1 = vcmp.eq.s32.totalorder %v1313_v0, 7  ;;  %394 = vmatpush.msra.mxu0 %v343_v53  ;;  %v1107_v61 = vld [vmem:[%s1781_s3 + $0x70] ss:$0 sm:$0xff]  ;;  %v341_v62 = vld [vmem:[%s1781_s3 + $0x80] sm:$0xff] }
  0xa3   :  { %v179_v8 = vld [vmem:[#allocation2] ss:$2 sm:$0xff]  ;;  %v183_v9 = vld [vmem:[#allocation2 + $0x1] ss:$2 sm:$0xff]  ;;  %372 = vmatpush.msrb.mxu3 %v350_v56  ;;  %v479_v50 = vsel %vm63_vm8, 0.0, %v471_v46  ;;  %v480_v53 = vsel %vm64_vm9, 0.0, %v472_v51 }
  0xa4   :  { %177 = vst.msk [vmem:[#allocation2 + $0x10] sm:$0xff] %vm174_vm12, %v172_v5  ;;  %v159_v12 = vadd.f32 %v155_v1, %v129_v6  ;;  %v186_v13 = vmax.f32 %v179_v8, %v183_v9  ;;  %v403_v63 = vld [vmem:[%s1781_s3 + $0x100] sm:$0xff]  ;;  %395 = vmatpush.msra.mxu0 %v342_v57  ;;  %v348_v5 = vld [vmem:[%s1781_s3 + $0xb8] sm:$0xff]  ;;  %vm1018_vm8 = vcmask 1024  }
  0xa5   :  { %373 = vmatpush.msrb.mxu3 %v349_v59  ;;  %v340_v9 = vld [vmem:[%s1781_s3 + $0x78] sm:$0xff]  ;;  %v726_v51 = vld [vmem:[%s1781_s3 + $0x2a0] sm:$0xff] }
  0xa6   :  { %v165_v4 = vadd.f32 %v1267_v17, %v159_v12  ;;  %188 = vst.msk [vmem:[#allocation3 + $0x8] sm:$0xff] %vm174_vm12, %v186_v13  ;;  %v1093_v17 = vcvt.f32.s32 %v1092_v20  ;;  %396 = vmatpush.msra.mxu0 %v341_v62  ;;  %v482_v12 = vld [vmem:[%s1781_s3 + $0x240] sm:$0xf] }
  0xa7   :  { %374 = vmatpush.msrb.mxu3 %v348_v5 }
  0xa8   :  { %v169_v2 = vmul.f32 0.2, %v165_v4  ;;  %v201_v25 = vmul.u32 8, %v1093_v17  ;;  %397 = vmatpush.msra.mxu0 %v340_v9  ;;  %v467_v17 = vld [vmem:[%s1782_s2 + $0x10] sm:$0xff] }
  0xaa   :  { %v173_v19 = vmax.f32 %v165_v4, %v169_v2  ;;  %v1323_v27 = vsub.s32 %v1160_v7, %v201_v25  ;;  %v466_v4 = vld [vmem:[%s1782_s2 + $0x8] sm:$0xff] }
  0xab   :  { %1034 = vmatmul.msk.f32.vlgmr.msra.gmra.mxu2 %vm484_vm13, %v466_v4 }
  0xac   :  { %178 = vst.msk [vmem:[#allocation2 + $0x18] sm:$0xff] %vm174_vm12, %v173_v19  ;;  %vm205_vm0 = vcmp.eq.s32.totalorder %v1323_v27, 0  ;;  %vm1785_vm2 = vcmp.eq.s32.totalorder %v1323_v27, 7 }
  0xad   :  { %v192_v21 = vld [vmem:[#allocation3 + $0x8] sm:$0xff] }
  0xae   :  { %v190_v22 = vld [vmem:[#allocation3 + $0x7] sm:$0xff]  ;;  %1024 = vmatmul.msk.f32.vlgmr.msra.gmra.mxu3 %vm174_vm12, %v192_v21  ;;  %v332_v21 = vmul.f32 0.25, %v1166_v10 }
  0xaf   :  { %v208_v16 = vsel %vm204_vm15, 0.0, %v190_v22  ;;  %1038 = vmatpush.msk.msra.mxu3 %vm1786_vm3, %v482_v12  ;;  %v1517_v12 = vld [vmem:[%s1781_s3 + $0x250] ss:$0 sm:$0xff] }
  0xb0   :  { %1026 = vmatmul.msk.f32.vlgmr.msra.gmra.mxu1 %vm174_vm12, %v208_v16  ;;  %v574_v16 = vld [vmem:[%s1781_s3 + $0x248] sm:$0xf]  ;;  %v1096_v25 = vfloor.f32 %v332_v21 }
  0xb1   :  { %421 = vmatpush.msra.mxu1 %v409_v37  ;;  %1043 = vmatpush.msk.msrb.mxu0 %vm1786_vm3, %v574_v16 }
  0xb3   :  { %v181_v23 = vld [vmem:[#allocation2 + $0x10] ss:$2 sm:$0xff]  ;;  %v185_v24 = vld [vmem:[#allocation2 + $0x11] ss:$2 sm:$0xff]  ;;  %422 = vmatpush.msra.mxu1 %v408_v41  ;;  %1035 = vmatmul.msk.f32.gmra.mxu2 %vm484_vm13, %v467_v17 }
  0xb4   :  { %v187_v26 = vmax.f32 %v181_v23, %v185_v24  ;;  %v1095_v24 = vceil.f32 %v332_v21  ;;  %v470_v41 = vld [vmem:[%s1782_s2 + $0x9] sm:$0xff] }
  0xb5   :  { %423 = vmatpush.msra.mxu1 %v407_v48  ;;  %v478_v43 = vsel %vm62_vm5, 0.0, %v470_v41  ;;  %v475_v48 = vsel %vm59_vm7, 0.0, %v463_v45  ;;  %v728_v45 = vld [vmem:[%s1781_s3 + $0x2b0] sm:$0xff]  ;;  %vm1787_vm5 = vcmp.eq.s32.totalorder %v1323_v27, 7  ;;  %v848_v27 = vld [vmem:[%s1781_s3 + $0x378] sm:$0xff]  ;;  %vm1008_vm7 = vcmask 254976  }
  0xb6   :  { %189 = vst.msk [vmem:[#allocation3 + $0x10] sm:$0xff] %vm174_vm12, %v187_v26 }
  0xb7   :  { %424 = vmatpush.msra.mxu1 %v406_v52  ;;  %v476_v52 = vsel %vm60_vm10, 0.0, %v464_v38 }
  0xb9   :  { %425 = vmatpush.msra.mxu1 %v405_v54  ;;  %v473_v54 = vld [vmem:[%s1782_s2 + $0x21] sm:$0xff] }
  0xba   :  { %v481_v56 = vsel %vm65_vm11, 0.0, %v473_v54 }
  0xbb   :  { %426 = vmatpush.msra.mxu1 %v404_v58 }
  0xbd   :  { %v193_v28 = vld [vmem:[#allocation3 + $0x10] sm:$0xff]  ;;  %427 = vmatpush.msra.mxu1 %v403_v63 }
  0xbe   :  { %v191_v29 = vld [vmem:[#allocation3 + $0xf] sm:$0xff]  ;;  %1025 = vmatmul.msk.f32.gmra.mxu3 %vm174_vm12, %v193_v28  ;;  %v468_v28 = vld [vmem:[%s1782_s2 + $0x18] sm:$0xff] }
  0xbf   :  { %v209_v30 = vsel %vm205_vm0, 0.0, %v191_v29  ;;  %v194_v31 = vld [vmem:[#allocation3 + $0x9] sm:$0xff]  ;;  %v195_v7 = vld [vmem:[#allocation3 + $0x11] sm:$0xff]  ;;  %428 = vmatpush.msra.mxu1 %v402_v11  ;;  %1036 = vmatmul.msk.f32.gmra.mxu2 %vm484_vm13, %v468_v28 }
  0xc0   :  { %1027 = vmatmul.msk.f32.gmra.mxu1 %vm174_vm12, %v209_v30  ;;  %v210_v32 = vsel %vm206_vm1, 0.0, %v194_v31  ;;  %v211_v33 = vsel %vm1785_vm2, 0.0, %v195_v7  ;;  %vm1094_vm2 = vcmp.lt.s32.totalorder %v332_v21, 0 }
  0xc1   :  { %v1097_v10 = vsel %vm1094_vm2, %v1095_v24, %v1096_v25 }
  0xc2   :  { %v1098_v29 = vcvt.f32.s32 %v1097_v10  ;;  %v660_v10 = vld [vmem:[%s1781_s3 + $0x260] sm:$0xff] }
  0xc8   :  { %1028 = vmatmul.msk.f32.vlgmr.msrb.gmra.mxu1 %vm174_vm12, %v210_v32  ;;  %v334_v32 = vmul.u32 4, %v1098_v29  ;;  %v659_v29 = vld [vmem:[%s1781_s3 + $0x258] sm:$0xff] }
  0xc9   :  { %685 = vmatpush.msrb.mxu1 %v666_v44 }
  0xd0   :  { %1029 = vmatmul.msk.f32.gmra.mxu1 %vm174_vm12, %v211_v33  ;;  %v469_v33 = vld [vmem:[%s1782_s2 + $0x20] sm:$0xff] }
  0xd1   :  { %1037 = vmatmul.msk.f32.gmra.mxu2 %vm484_vm13, %v469_v33 }
 0x12d   :  { %v272_v34 = vpop.f32.mrf.mxu1 }
 0x12e   :  { %v518_v58 = vpop.f32.mrf.mxu2 }
 0x131   :  { %v243_v55 = vpop.f32.mrf.mxu3 }
 0x132   :  { %v273_v60 = vadd.f32 %v272_v34, %v243_v55  ;;  %v1445_v34 = vsub.s32 %v1152_v3, %v334_v32  ;;  %v462_v3 = vld [vmem:[%s1782_s2 + $0x7] sm:$0xff]  ;;  %v477_v55 = vsel %vm61_vm6, 0.0, %v465_v47  ;;  %vm1788_vm6 = vcmask 1043456  }
 0x134   :  { %vm336_vm2 = vcmp.eq.s32.totalorder %v1445_v34, 0  ;;  %vm337_vm3 = vcmp.eq.s32.totalorder %v1445_v34, 3  ;;  %v937_v34 = vld [vmem:[%s1781_s3 + $0x198] sm:$0xff] }
 0x13d   :  { %v275_v42 = vpop.f32.mrf.mxu1 }
 0x141   :  { %v246_v13 = vpop.f32.mrf.mxu3 }
 0x142   :  { %v276_v15 = vadd.f32 %v275_v42, %v246_v13  ;;  %v474_v42 = vsel %vm58_vm4, 0.0, %v462_v3  ;;  %v521_v13 = vpop.f32.mrf.mxu2  ;;  %vm455_vm4 = vcmask 1041408  }
 0x145   :  { %v305_v1 = vpop.f32.mrf.mxu1 }
 0x146   :  { %v311_v6 = vadd.f32 %v305_v1, %v273_v60  ;;  %v1108_v60 = vld [vmem:[%s1781_s3 + $0x138] ss:$0 sm:$0xff] }
 0x148   :  { %v315_v8 = vadd.f32 %v1107_v61, %v311_v6 }
 0x14a   :  { %v317_v2 = vmul.f32 0.2, %v315_v8  ;;  %v524_v28 = vpop.f32.mrf.mxu2 }
 0x14c   :  { %v319_v18 = vmax.f32 %v315_v8, %v317_v2  ;;  %v665_v8 = vld [vmem:[%s1781_s3 + $0x288] sm:$0xff] }
 0x14d   :  { %v308_v19 = vpop.f32.mrf.mxu1  ;;  %1061 = vmatpush.msrb.mxu2 %v665_v8  ;;  %686 = vmatpush.msrb.mxu1 %v665_v8 }
 0x14e   :  { %322 = vst.msk [vmem:[#allocation4] sm:$0xff] %vm321_vm14, %v319_v18  ;;  %v312_v20 = vadd.f32 %v308_v19, %v276_v15  ;;  %v663_v15 = vld [vmem:[%s1781_s3 + $0x278] sm:$0xff]  ;;  %v662_v19 = vld [vmem:[%s1781_s3 + $0x270] sm:$0xff] }
 0x14f   :  { %687 = vmatpush.msrb.mxu1 %v664_v14  ;;  %1062 = vmatpush.msrb.mxu2 %v664_v14 }
 0x150   :  { %v316_v22 = vadd.f32 %v1107_v61, %v312_v20 }
 0x151   :  { %688 = vmatpush.msrb.mxu1 %v663_v15  ;;  %1063 = vmatpush.msrb.mxu2 %v663_v15  ;;  %v794_v15 = vld [vmem:[%s1781_s3 + $0x338] sm:$0xff] }
 0x152   :  { %v318_v23 = vmul.f32 0.2, %v316_v22 }
 0x153   :  { %747 = vmatpush.msra.mxu2 %v728_v45  ;;  %v841_v45 = vld [vmem:[%s1781_s3 + $0x340] sm:$0xff] }
 0x154   :  { %v320_v26 = vmax.f32 %v316_v22, %v318_v23  ;;  %v661_v22 = vld [vmem:[%s1781_s3 + $0x268] sm:$0xff]  ;;  %v527_v46 = vpop.f32.mrf.mxu2 }
 0x156   :  { %323 = vst.msk [vmem:[#allocation4 + $0x8] sm:$0xff] %vm321_vm14, %v320_v26 }
 0x15d   :  { %v324_v30 = vld [vmem:[#allocation4] ss:$2 sm:$0xff]  ;;  %v326_v31 = vld [vmem:[#allocation4 + $0x1] ss:$2 sm:$0xff] }
 0x15e   :  { %v327_v7 = vmax.f32 %v324_v30, %v326_v31 }
 0x160   :  { %328 = vst.msk [vmem:[#allocation5 + $0x8] sm:$0xff] %vm321_vm14, %v327_v7 }
 0x167   :  { %v330_v35 = vld [vmem:[#allocation5 + $0x8] sm:$0xff] }
 0x168   :  { %v329_v36 = vld [vmem:[#allocation5 + $0x7] sm:$0xff]  ;;  %1030 = vmatmul.msk.f32.vlgmr.msrb.gmra.mxu3 %vm321_vm14, %v330_v35 }
 0x169   :  { %v331_v37 = vld [vmem:[#allocation5 + $0x9] sm:$0xff]  ;;  %v338_v39 = vsel %vm336_vm2, 0.0, %v329_v36  ;;  %806 = vmatpush.msrb.mxu3 %v794_v15  ;;  %v932_v15 = vld [vmem:[%s1781_s3 + $0x170] sm:$0xff] }
 0x16a   :  { %v339_v40 = vsel %vm337_vm3, 0.0, %v331_v37  ;;  %1031 = vmatmul.msk.f32.vlgmr.msra.gmra.mxu0 %vm321_vm14, %v338_v39  ;;  %v1110_v36 = vld [vmem:[%s1781_s3 + $0x140] ss:$0 sm:$0xff]  ;;  %v1111_v37 = vld [vmem:[%s1781_s3 + $0x141] ss:$0 sm:$0xff] }
 0x16b   :  { %1032 = vmatmul.msk.f32.vlgmr.msra.gmra.mxu1 %vm321_vm14, %v339_v40 }
 0x16c   :  { %714 = vmatpush.msra.mxu1 %v662_v19  ;;  %v786_v19 = vld [vmem:[%s1781_s3 + $0x2f8] sm:$0xff] }
 0x16d   :  { %829 = vmatpush.msra.mxu0 %v786_v19 }
 0x16e   :  { %715 = vmatpush.msra.mxu1 %v661_v22 }
 0x170   :  { %1039 = vmatmul.msk.f32.vlgmr.msra.gmra.mxu3 %vm484_vm13, %v474_v42  ;;  %716 = vmatpush.msra.mxu1 %v660_v10 }
 0x172   :  { %1044 = vmatmul.msk.f32.vlgmr.msrb.gmra.mxu0 %vm484_vm13, %v478_v43  ;;  %717 = vmatpush.msra.mxu1 %v659_v29  ;;  %v845_v29 = vld [vmem:[%s1781_s3 + $0x360] sm:$0xff] }
 0x178   :  { %1040 = vmatmul.msk.f32.gmra.mxu3 %vm484_vm13, %v475_v48  ;;  %v727_v48 = vld [vmem:[%s1781_s3 + $0x2a8] sm:$0xff] }
 0x179   :  { %748 = vmatpush.msra.mxu2 %v727_v48 }
 0x17a   :  { %1045 = vmatmul.msk.f32.gmra.mxu0 %vm484_vm13, %v479_v50 }
 0x17b   :  { %749 = vmatpush.msra.mxu2 %v726_v51 }
 0x180   :  { %1041 = vmatmul.msk.f32.gmra.mxu3 %vm484_vm13, %v476_v52 }
 0x182   :  { %1046 = vmatmul.msk.f32.gmra.mxu0 %vm484_vm13, %v480_v53 }
 0x188   :  { %1042 = vmatmul.msk.f32.gmra.mxu3 %vm484_vm13, %v477_v55 }
 0x18a   :  { %1047 = vmatmul.msk.f32.gmra.mxu0 %vm484_vm13, %v481_v56  ;;  %v725_v56 = vld [vmem:[%s1781_s3 + $0x298] sm:$0xff] }
 0x18b   :  { %750 = vmatpush.msra.mxu2 %v725_v56 }
 0x1e7   :  { %v399_v49 = vpop.f32.mrf.mxu0 }
 0x1e8   :  { %v430_v61 = vpop.f32.mrf.mxu1 }
 0x1eb   :  { %v376_v57 = vpop.f32.mrf.mxu3 }
 0x1ec   :  { %v400_v59 = vadd.f32 %v399_v49, %v376_v57 }
 0x1ee   :  { %v433_v62 = vadd.f32 %v430_v61, %v400_v59 }
 0x1ef   :  { %v607_v63 = vpop.f32.mrf.mxu0 }
 0x1f0   :  { %v436_v1 = vadd.f32 %v1108_v60, %v433_v62 }
 0x1f2   :  { %v437_v5 = vmul.f32 0.2, %v436_v1 }
 0x1f3   :  { %v562_v6 = vpop.f32.mrf.mxu3 }
 0x1f4   :  { %v438_v9 = vmax.f32 %v436_v1, %v437_v5  ;;  %v563_v11 = vadd.f32 %v562_v6, %v518_v58 }
 0x1f6   :  { %439 = vst [vmem:[#allocation6] sm:$0xff] %v438_v9  ;;  %v619_v4 = vadd.f32 %v607_v63, %v563_v11 }
 0x1f7   :  { %v610_v2 = vpop.f32.mrf.mxu0 }
 0x1f8   :  { %v625_v18 = vadd.f32 %v1517_v12, %v619_v4 }
 0x1fa   :  { %v629_v20 = vmul.f32 0.2, %v625_v18 }
 0x1fb   :  { %v565_v21 = vpop.f32.mrf.mxu3 }
 0x1fc   :  { %v633_v16 = vmax.f32 %v625_v18, %v629_v20  ;;  %v566_v17 = vadd.f32 %v565_v21, %v521_v13  ;;  %v793_v18 = vld [vmem:[%s1781_s3 + $0x330] sm:$0xff] }
 0x1fd   :  { %v440_v23 = vld [vmem:[#allocation6] ss:$2 sm:$0xf]  ;;  %v442_v24 = vld [vmem:[#allocation6 + $0x1] ss:$2 sm:$0xf]  ;;  %807 = vmatpush.msrb.mxu3 %v793_v18 }
 0x1fe   :  { %637 = vst.msk [vmem:[#allocation2] sm:$0xff] %vm174_vm12, %v633_v16  ;;  %v620_v25 = vadd.f32 %v610_v2, %v566_v17  ;;  %v443_v26 = vmax.f32 %v440_v23, %v442_v24  ;;  %v785_v20 = vld [vmem:[%s1781_s3 + $0x2f0] sm:$0xff]  ;;  %v792_v16 = vld [vmem:[%s1781_s3 + $0x328] sm:$0xff]  ;;  %v791_v24 = vld [vmem:[%s1781_s3 + $0x320] sm:$0xff] }
 0x1ff   :  { %v613_v31 = vpop.f32.mrf.mxu0  ;;  %v847_v21 = vld [vmem:[%s1781_s3 + $0x370] sm:$0xff]  ;;  %830 = vmatpush.msra.mxu0 %v785_v20  ;;  %808 = vmatpush.msrb.mxu3 %v792_v16  ;;  %v784_v17 = vld [vmem:[%s1781_s3 + $0x2e8] sm:$0xff]  ;;  %v977_v16 = vld [vmem:[%s1781_s3 + $0x220] sm:$0xff] }
 0x200   :  { %v626_v30 = vadd.f32 %v1517_v12, %v620_v25  ;;  %444 = vst [vmem:[#allocation7] sm:$0xf] %v443_v26  ;;  %v846_v23 = vld [vmem:[%s1781_s3 + $0x368] sm:$0xff]  ;;  %v790_v25 = vld [vmem:[%s1781_s3 + $0x318] sm:$0xff]  ;;  %v789_v26 = vld [vmem:[%s1781_s3 + $0x310] sm:$0xff] }
 0x201   :  { %831 = vmatpush.msra.mxu0 %v784_v17  ;;  %809 = vmatpush.msrb.mxu3 %v791_v24  ;;  %v931_v18 = vld [vmem:[%s1781_s3 + $0x168] sm:$0xff]  ;;  %v976_v17 = vld [vmem:[%s1781_s3 + $0x218] sm:$0xff]  ;;  %v975_v24 = vld [vmem:[%s1781_s3 + $0x210] sm:$0xff] }
 0x202   :  { %v630_v32 = vmul.f32 0.2, %v626_v30 }
 0x203   :  { %v568_v7 = vpop.f32.mrf.mxu3  ;;  %810 = vmatpush.msrb.mxu3 %v790_v25 }
 0x204   :  { %v634_v33 = vmax.f32 %v626_v30, %v630_v32  ;;  %v569_v35 = vadd.f32 %v568_v7, %v524_v28  ;;  %v783_v28 = vld [vmem:[%s1781_s3 + $0x2e0] sm:$0xff]  ;;  %v782_v30 = vld [vmem:[%s1781_s3 + $0x2d8] sm:$0xff]  ;;  %v788_v32 = vld [vmem:[%s1781_s3 + $0x308] sm:$0xff] }
 0x205   :  { %832 = vmatpush.msra.mxu0 %v783_v28  ;;  %v781_v7 = vld [vmem:[%s1781_s3 + $0x2d0] sm:$0xff]  ;;  %811 = vmatpush.msrb.mxu3 %v789_v26  ;;  %v1115_v26 = vld [vmem:[%s1781_s3 + $0x158] ss:$0 sm:$0xff] }
 0x206   :  { %638 = vst.msk [vmem:[#allocation2 + $0x8] sm:$0xff] %vm174_vm12, %v634_v33  ;;  %v621_v39 = vadd.f32 %v613_v31, %v569_v35  ;;  %v844_v31 = vld [vmem:[%s1781_s3 + $0x358] sm:$0xff] }
 0x207   :  { %v445_v40 = vld [vmem:[#allocation7] ss:$2 sm:$0x3]  ;;  %v450_v3 = vld [vmem:[#allocation7 + $0x1] ss:$2 sm:$0x3]  ;;  %v616_v53 = vpop.f32.mrf.mxu0  ;;  %833 = vmatpush.msra.mxu0 %v782_v30  ;;  %812 = vmatpush.msrb.mxu3 %v788_v32 }
 0x208   :  { %v627_v41 = vadd.f32 %v1517_v12, %v621_v39  ;;  %v448_v42 = vmul.f32 %v1110_v36, %v445_v40  ;;  %v453_v43 = vmul.f32 %v1111_v37, %v450_v3  ;;  %v1113_v35 = vld [vmem:[%s1781_s3 + $0x2b8] ss:$0 sm:$0xff]  ;;  %v843_v36 = vld [vmem:[%s1781_s3 + $0x350] sm:$0xff]  ;;  %v787_v39 = vld [vmem:[%s1781_s3 + $0x300] sm:$0xff] }
 0x209   :  { %v780_v40 = vld [vmem:[%s1781_s3 + $0x2c8] sm:$0xff]  ;;  %834 = vmatpush.msra.mxu0 %v781_v7  ;;  %813 = vmatpush.msrb.mxu3 %v787_v39 }
 0x20a   :  { %v631_v50 = vmul.f32 0.2, %v627_v41  ;;  %v454_v38 = vadd.f32 %v453_v43, %v448_v42  ;;  %v779_v43 = vld [vmem:[%s1781_s3 + $0x2c0] sm:$0xff]  ;;  %v1117_v39 = vld [vmem:[%s1781_s3 + $0x389] ss:$0 sm:$0xff] }
 0x20b   :  { %v571_v52 = vpop.f32.mrf.mxu3  ;;  %835 = vmatpush.msra.mxu0 %v780_v40 }
 0x20c   :  { %v635_v47 = vmax.f32 %v627_v41, %v631_v50  ;;  %v572_v54 = vadd.f32 %v571_v52, %v527_v46  ;;  %v456_v55 = vsel %vm455_vm4, %v454_v38, 0.0  ;;  %v842_v41 = vld [vmem:[%s1781_s3 + $0x348] sm:$0xff]  ;;  %v899_v46 = vld [vmem:[%s1781_s3 + $0x150] sm:$0xf] }
 0x20d   :  { %v641_v49 = vld [vmem:[#allocation2] ss:$2 sm:$0xff]  ;;  %v643_v57 = vld [vmem:[#allocation2 + $0x1] ss:$2 sm:$0xff]  ;;  %457 = vadd.xlane.f32.xlu0 %v456_v55  ;;  %1057 = vmatpush.msk.msra.mxu3 %vm1788_vm6, %v899_v46  ;;  %v944_v55 = vld [vmem:[%s1781_s3 + $0x1d0] sm:$0xff] }
 0x20e   :  { %v645_v58 = vmax.f32 %v641_v49, %v643_v57  ;;  %639 = vst.msk [vmem:[#allocation2 + $0x10] sm:$0xff] %vm174_vm12, %v635_v47  ;;  %v622_v59 = vadd.f32 %v616_v53, %v572_v54  ;;  %836 = vmatpush.msra.mxu0 %v779_v43  ;;  %v945_v54 = vld [vmem:[%s1781_s3 + $0x1d8] sm:$0xff]  ;;  %v943_v49 = vld [vmem:[%s1781_s3 + $0x1c8] sm:$0xff]  ;;  %v973_v46 = vld [vmem:[%s1781_s3 + $0x200] sm:$0xff] }
 0x210   :  { %647 = vst.msk [vmem:[#allocation3 + $0x8] sm:$0xff] %vm174_vm12, %v645_v58  ;;  %v628_v60 = vadd.f32 %v1517_v12, %v622_v59  ;;  %v942_v58 = vld [vmem:[%s1781_s3 + $0x1c0] sm:$0xff]  ;;  %v941_v59 = vld [vmem:[%s1781_s3 + $0x1b8] sm:$0xff]  ;;  %991 = vmatpush.msrb.mxu0 %v977_v16 }
 0x212   :  { %v632_v61 = vmul.f32 0.2, %v628_v60  ;;  %992 = vmatpush.msrb.mxu0 %v976_v17 }
 0x214   :  { %v636_v62 = vmax.f32 %v628_v60, %v632_v61  ;;  %v940_v60 = vld [vmem:[%s1781_s3 + $0x1b0] sm:$0xff]  ;;  %993 = vmatpush.msrb.mxu0 %v975_v24 }
 0x216   :  { %640 = vst.msk [vmem:[#allocation2 + $0x18] sm:$0xff] %vm174_vm12, %v636_v62 }
 0x217   :  { %v651_v63 = vld [vmem:[#allocation3 + $0x8] sm:$0xff] }
 0x218   :  { %1048 = vmatmul.msk.f32.vlgmr.msrb.gmra.mxu1 %vm174_vm12, %v651_v63  ;;  %v649_v1 = vld [vmem:[#allocation3 + $0x7] sm:$0xff] }
 0x219   :  { %v655_v8 = vsel %vm204_vm15, 0.0, %v649_v1  ;;  %860 = vmatpush.msrb.mxu1 %v848_v27 }
 0x21b   :  { %861 = vmatpush.msrb.mxu1 %v847_v21  ;;  %v1114_v21 = vld [vmem:[%s1781_s3 + $0x380] ss:$0 sm:$0xff] }
 0x21d   :  { %v642_v44 = vld [vmem:[#allocation2 + $0x10] ss:$2 sm:$0xff]  ;;  %v644_v5 = vld [vmem:[#allocation2 + $0x11] ss:$2 sm:$0xff]  ;;  %862 = vmatpush.msrb.mxu1 %v846_v23 }
 0x21e   :  { %v646_v6 = vmax.f32 %v642_v44, %v644_v5 }
 0x21f   :  { %863 = vmatpush.msrb.mxu1 %v845_v29 }
 0x220   :  { %648 = vst.msk [vmem:[#allocation3 + $0x10] sm:$0xff] %vm174_vm12, %v646_v6  ;;  %1050 = vmatmul.msk.f32.vlgmr.msra.gmra.mxu1 %vm174_vm12, %v655_v8 }
 0x221   :  { %864 = vmatpush.msrb.mxu1 %v844_v31 }
 0x223   :  { %865 = vmatpush.msrb.mxu1 %v843_v36 }
 0x225   :  { %866 = vmatpush.msrb.mxu1 %v842_v41 }
 0x227   :  { %v652_v9 = vld [vmem:[#allocation3 + $0x10] sm:$0xff]  ;;  %867 = vmatpush.msrb.mxu1 %v841_v45 }
 0x228   :  { %v650_v11 = vld [vmem:[#allocation3 + $0xf] sm:$0xff]  ;;  %1049 = vmatmul.msk.f32.vlgmr.msrb.gmra.mxu2 %vm174_vm12, %v652_v9  ;;  %v898_v9 = vld [vmem:[%s1783_s1] sm:$0x3] }
 0x229   :  { %v656_v12 = vsel %vm205_vm0, 0.0, %v650_v11  ;;  %v653_v13 = vld [vmem:[#allocation3 + $0x9] sm:$0xff]  ;;  %v654_v4 = vld [vmem:[#allocation3 + $0x11] sm:$0xff]  ;;  %948 = vmatpush.msrb.mxu2 %v945_v54 }
 0x22a   :  { %1051 = vmatmul.msk.f32.gmra.mxu1 %vm174_vm12, %v656_v12  ;;  %v657_v14 = vsel %vm206_vm1, 0.0, %v653_v13  ;;  %v658_v2 = vsel %vm1787_vm5, 0.0, %v654_v4  ;;  %v939_v11 = vld [vmem:[%s1781_s3 + $0x1a8] sm:$0xff]  ;;  %v938_v12 = vld [vmem:[%s1781_s3 + $0x1a0] sm:$0xff]  ;;  %v936_v13 = vld [vmem:[%s1781_s3 + $0x190] sm:$0xff] }
 0x22b   :  { %949 = vmatpush.msrb.mxu2 %v944_v55  ;;  %v934_v4 = vld [vmem:[%s1781_s3 + $0x180] sm:$0xff]  ;;  %v1120_v55 = vld [vmem:[%s1781_s3 + $0x228] ss:$0 sm:$0xff] }
 0x22d   :  { %950 = vmatpush.msrb.mxu2 %v943_v49 }
 0x22f   :  { %951 = vmatpush.msrb.mxu2 %v942_v58  ;;  %v1121_v58 = vld [vmem:[%s1781_s3 + $0x230] ss:$0 sm:$0xff] }
 0x230   :  { %1052 = vmatmul.msk.f32.vlgmr.msra.gmra.mxu2 %vm174_vm12, %v657_v14  ;;  %v935_v14 = vld [vmem:[%s1781_s3 + $0x188] sm:$0xff] }
 0x231   :  { %952 = vmatpush.msrb.mxu2 %v941_v59 }
 0x233   :  { %953 = vmatpush.msrb.mxu2 %v940_v60 }
 0x235   :  { %954 = vmatpush.msrb.mxu2 %v939_v11 }
 0x237   :  { %955 = vmatpush.msrb.mxu2 %v938_v12 }
 0x238   :  { %1053 = vmatmul.msk.f32.gmra.mxu2 %vm174_vm12, %v658_v2  ;;  %v933_v2 = vld [vmem:[%s1781_s3 + $0x178] sm:$0xff] }
 0x239   :  { %956 = vmatpush.msrb.mxu2 %v937_v34 }
 0x23b   :  { %957 = vmatpush.msrb.mxu2 %v936_v13 }
 0x23d   :  { %958 = vmatpush.msrb.mxu2 %v935_v14 }
 0x23f   :  { %959 = vmatpush.msrb.mxu2 %v934_v4 }
 0x241   :  { %960 = vmatpush.msrb.mxu2 %v933_v2 }
 0x243   :  { %961 = vmatpush.msrb.mxu2 %v932_v15 }
 0x245   :  { %962 = vmatpush.msrb.mxu2 %v931_v18 }
 0x295   :  { %v690_v0 = vpop.f32.mrf.mxu1 }
 0x29d   :  { %v719_v10 = vpop.f32.mrf.mxu1 }
 0x29e   :  { %v720_v33 = vadd.f32 %v719_v10, %v690_v0  ;;  %v930_v0 = vld [vmem:[%s1781_s3 + $0x160] sm:$0xff]  ;;  %v974_v10 = vld [vmem:[%s1781_s3 + $0x208] sm:$0xff] }
 0x29f   :  { %963 = vmatpush.msrb.mxu2 %v930_v0  ;;  %994 = vmatpush.msrb.mxu0 %v974_v10 }
 0x2a1   :  { %995 = vmatpush.msrb.mxu0 %v973_v46 }
 0x2a7   :  { %v722_v50 = vpop.f32.mrf.mxu1 }
 0x2ab   :  { %v693_v22 = vpop.f32.mrf.mxu2 }
 0x2ac   :  { %v723_v38 = vadd.f32 %v722_v50, %v693_v22  ;;  %v971_v50 = vld [vmem:[%s1781_s3 + $0x1f0] sm:$0xff] }
 0x2b3   :  { %v752_v37 = vpop.f32.mrf.mxu2 }
 0x2b4   :  { %v758_v3 = vadd.f32 %v752_v37, %v720_v33  ;;  %v1116_v37 = vld [vmem:[%s1781_s3 + $0x388] ss:$0 sm:$0xff] }
 0x2b6   :  { %v762_v42 = vadd.f32 %v1113_v35, %v758_v3 }
 0x2b8   :  { %v764_v48 = vmul.f32 0.2, %v762_v42 }
 0x2ba   :  { %v766_v51 = vmax.f32 %v762_v42, %v764_v48  ;;  %v972_v48 = vld [vmem:[%s1781_s3 + $0x1f8] sm:$0xff] }
 0x2bb   :  { %v755_v52 = vpop.f32.mrf.mxu2  ;;  %996 = vmatpush.msrb.mxu0 %v972_v48 }
 0x2bc   :  { %768 = vst.msk [vmem:[#allocation4] sm:$0xff] %vm321_vm14, %v766_v51  ;;  %v759_v53 = vadd.f32 %v755_v52, %v723_v38  ;;  %v970_v38 = vld [vmem:[%s1781_s3 + $0x1e8] sm:$0xff]  ;;  %v1118_v51 = vld [vmem:[%s1781_s3 + $0x1e0] ss:$0 sm:$0xff] }
 0x2bd   :  { %997 = vmatpush.msrb.mxu0 %v971_v50 }
 0x2be   :  { %v763_v47 = vadd.f32 %v1113_v35, %v759_v53 }
 0x2bf   :  { %998 = vmatpush.msrb.mxu0 %v970_v38 }
 0x2c0   :  { %v765_v56 = vmul.f32 0.2, %v763_v47 }
 0x2c2   :  { %v767_v57 = vmax.f32 %v763_v47, %v765_v56 }
 0x2c4   :  { %769 = vst.msk [vmem:[#allocation4 + $0x8] sm:$0xff] %vm321_vm14, %v767_v57 }
 0x2cb   :  { %v770_v61 = vld [vmem:[#allocation4] ss:$2 sm:$0xff]  ;;  %v771_v62 = vld [vmem:[#allocation4 + $0x1] ss:$2 sm:$0xff] }
 0x2cc   :  { %v772_v63 = vmax.f32 %v770_v61, %v771_v62  ;;  %v1112_v62 = vld [vmem:[%s1781_s3 + $0x148] ss:$0 sm:$0xff] }
 0x2ce   :  { %773 = vst.msk [vmem:[#allocation5 + $0x8] sm:$0xff] %vm321_vm14, %v772_v63  ;;  %v1122_v63 = vld [vmem:[%s1781_s3 + $0x238] ss:$0 sm:$0xff] }
 0x2d5   :  { %v775_v1 = vld [vmem:[#allocation5 + $0x8] sm:$0xff] }
 0x2d6   :  { %v774_v44 = vld [vmem:[#allocation5 + $0x7] sm:$0xff]  ;;  %1054 = vmatmul.msk.f32.vlgmr.msrb.gmra.mxu3 %vm321_vm14, %v775_v1  ;;  %v458_v1 = vpop.xlane.xlu0 %457 }
 0x2d7   :  { %v776_v5 = vld [vmem:[#allocation5 + $0x9] sm:$0xff]  ;;  %v777_v6 = vsel %vm336_vm2, 0.0, %v774_v44  ;;  %v1119_v44 = vld [vmem:[%s1781_s3 + $0x390] ss:$0 sm:$0xff] }
 0x2d8   :  { %v778_v8 = vsel %vm337_vm3, 0.0, %v776_v5  ;;  %1055 = vmatmul.msk.f32.vlgmr.msra.gmra.mxu0 %vm321_vm14, %v777_v6 }
 0x2d9   :  { %1056 = vmatmul.msk.f32.vlgmr.msrb.gmra.mxu1 %vm321_vm14, %v778_v8  ;;  %v461_v8 = vadd.f32 %v1112_v62, %v458_v1 }
 0x2de   :  { %1058 = vmatmul.msk.f32.vlgmr.msra.gmra.mxu3 %vm484_vm13, %v898_v9 }
 0x355   :  { %v838_v19 = vpop.f32.mrf.mxu0 }
 0x356   :  { %v869_v22 = vpop.f32.mrf.mxu1 }
 0x359   :  { %v815_v27 = vpop.f32.mrf.mxu3 }
 0x35a   :  { %v839_v20 = vadd.f32 %v838_v19, %v815_v27 }
 0x35c   :  { %v872_v23 = vadd.f32 %v869_v22, %v839_v20 }
 0x35e   :  { %v875_v25 = vadd.f32 %v1114_v21, %v872_v23 }
 0x360   :  { %v876_v28 = vmul.f32 0.2, %v875_v25 }
 0x361   :  { %v925_v29 = vpop.f32.mrf.mxu3 }
 0x362   :  { %v877_v30 = vmax.f32 %v875_v25, %v876_v28  ;;  %v926_v31 = vadd.f32 %v1115_v26, %v925_v29 }
 0x364   :  { %878 = vst [vmem:[#allocation6] sm:$0xff] %v877_v30  ;;  %v928_v32 = vmul.f32 0.2, %v926_v31 }
 0x366   :  { %v929_v7 = vmax.f32 %v926_v31, %v928_v32 }
 0x368   :  { %964 = vmatmul.f32.vlgmr.msrb.gmra.mxu2 %v929_v7 }
 0x36b   :  { %v879_v33 = vld [vmem:[#allocation6] ss:$2 sm:$0xf]  ;;  %v880_v35 = vld [vmem:[#allocation6 + $0x1] ss:$2 sm:$0xf] }
 0x36c   :  { %v881_v36 = vmax.f32 %v879_v33, %v880_v35 }
 0x36e   :  { %882 = vst [vmem:[#allocation7] sm:$0xf] %v881_v36 }
 0x375   :  { %v883_v40 = vld [vmem:[#allocation7] ss:$2 sm:$0x3]  ;;  %v887_v3 = vld [vmem:[#allocation7 + $0x1] ss:$2 sm:$0x3] }
 0x376   :  { %v886_v41 = vmul.f32 %v1116_v37, %v883_v40  ;;  %v890_v42 = vmul.f32 %v1117_v39, %v887_v3 }
 0x378   :  { %v891_v43 = vadd.f32 %v890_v42, %v886_v41 }
 0x37a   :  { %v892_v45 = vsel %vm455_vm4, %v891_v43, 0.0 }
 0x37b   :  { %893 = vadd.xlane.f32.xlu2 %v892_v45 }
 0x3eb   :  { %v965_v52 = vpop.f32.mrf.mxu2 }
 0x3ec   :  { %v966_v53 = vadd.f32 %v1118_v51, %v965_v52 }
 0x3ee   :  { %v968_v47 = vmul.f32 0.2, %v966_v53  ;;  %v894_v5 = vpop.xlane.xlu2 %893 }
 0x3ef   :  { %v897_v11 = vadd.f32 %v1119_v44, %v894_v5 }
 0x3f0   :  { %v969_v54 = vmax.f32 %v966_v53, %v968_v47 }
 0x3f2   :  { %1059 = vmatmul.msk.f32.vlgmr.msrb.gmra.mxu0 %vm321_vm14, %v969_v54 }
 0x46f   :  { %v1000_v56 = vpop.f32.mrf.mxu0 }
 0x470   :  { %v1001_v49 = vadd.f32 %v1120_v55, %v1000_v56 }
 0x472   :  { %v1003_v57 = vmul.f32 0.2, %v1001_v49 }
 0x474   :  { %v1004_v59 = vmax.f32 %v1001_v49, %v1003_v57 }
 0x476   :  { %v1007_v60 = vmul.f32 %v1121_v58, %v1004_v59 }
 0x478   :  { %v1009_v61 = vsel %vm1008_vm7, %v1007_v60, 0.0 }
 0x479   :  { %1010 = vadd.xlane.f32.xlu1 %v1009_v61 }
 0x4ec   :  { %v1011_v6 = vpop.xlane.xlu1 %1010 }
 0x4ed   :  { %v1014_v9 = vadd.f32 %v1122_v63, %v1011_v6 }
 0x4ef   :  { %v1015_v12 = vadd.f32 %v1014_v9, %v461_v8 }
 0x4f1   :  { %v1016_v34 = vadd.f32 %v1015_v12, %v897_v11 }
 0x4f3   :  { %v1017_v13 = vmul.f32 0.33333334, %v1016_v34 }
 0x4f5   :  { %1019 = vst.msk [vmem:[%s1784_s4] sm:$0x3] %vm1018_vm8, %v1017_v13 }

</bundles_post_ra>
